<compile_context>
chip_gen: v5e
topology: v5e:2x2
jax: 0.10.0
libtpu: 0.0.40
codegen_flags: <defaults>
</compile_context>

<pallas_src>
import functools

import numpy as np
import jax
import jax.numpy as jnp
from jax import lax
from jax.experimental import pallas as pl
from jax.experimental.pallas import tpu as pltpu

NODE_BUCKET = 128     # fixed node-count bucket (lane-aligned adjacency)
GAT_TM = 128          # GAT target-row tile


# ---------------------------------------------------------------------------
# Kernel A: batched CNN encoder
#   mask -> Conv1d (per filter size, as k shifted matmuls) -> ReLU -> max-pool
#   -> concat -> fc_cnn -> ReLU
# ---------------------------------------------------------------------------
def _cnn_kernel(word_ref, mask_ref, *refs, filter_sizes, filter_num, w_len, tile_n):
    nconv = len(filter_sizes)
    conv_w_refs = refs[:nconv]
    conv_b_refs = refs[nconv:2 * nconv]
    wfc_ref = refs[2 * nconv]
    bfc_ref = refs[2 * nconv + 1]
    out_ref = refs[2 * nconv + 2]

    rows = tile_n * w_len
    # masked_fill(mask == 0, 0.0) == multiply by the {0,1} mask
    x = (word_ref[...] * mask_ref[...]).reshape(rows, -1)        # (rows, D_bert) f32

    # Pre-shifted copies of the slab: x_shift[j][r] = x[r + j] (mod rows).
    # Rows that read across an utterance boundary correspond to invalid conv
    # positions and are masked out before the max-pool.
    max_k = max(filter_sizes)
    x_shift = [x.astype(jnp.bfloat16)]
    for j in range(1, max_k):
        x_shift.append(pltpu.roll(x, shift=rows - j, axis=0).astype(jnp.bfloat16))

    # time index inside each utterance (to drop invalid conv positions)
    t_idx = lax.broadcasted_iota(jnp.int32, (tile_n, w_len, 1), 1)

    pooled = []
    for k, w_r, b_r in zip(filter_sizes, conv_w_refs, conv_b_refs):
        acc = jnp.zeros((rows, filter_num), jnp.float32)
        for j in range(k):                        # static unroll over kernel taps
            acc = acc + jnp.dot(x_shift[j], w_r[j],
                                preferred_element_type=jnp.float32)
        acc = jnp.maximum(acc + b_r[...], 0.0)                   # bias + ReLU
        acc = acc.reshape(tile_n, w_len, filter_num)
        acc = jnp.where(t_idx < (w_len - k + 1), acc, -1.0)      # drop invalid t
        pooled.append(jnp.max(acc, axis=1))                      # (tile_n, F)
    cat = jnp.concatenate(pooled, axis=-1).astype(jnp.bfloat16)  # (tile_n, nconv*F)
    feat = jnp.dot(cat, wfc_ref[...], preferred_element_type=jnp.float32) + bfc_ref[...]
    out_ref[...] = jnp.maximum(feat, 0.0)                        # (tile_n, D_cnn_pad)


def cnn_encode(word_emb, mask, params, filter_sizes, filter_num, D_cnn):
    N, w_len, D_bert = word_emb.shape
    nconv = len(filter_sizes)
    total = nconv * filter_num

    tile_n = max(8, -(-256 // w_len))              # >=256 matmul rows per grid step
    n_pad = -(-N // tile_n) * tile_n
    d_pad = -(-D_cnn // 128) * 128                 # lane-dense output store

    word_p = jnp.pad(word_emb, ((0, n_pad - N), (0, 0), (0, 0)))
    mask_p = jnp.pad(mask, ((0, n_pad - N), (0, 0), (0, 0)))
    fc_w = jnp.pad(params["fc_w"], ((0, 0), (0, d_pad - D_cnn))).astype(jnp.bfloat16)
    fc_b = jnp.pad(params["fc_b"], ((0, 0), (0, d_pad - D_cnn)))

    kernel = functools.partial(_cnn_kernel, filter_sizes=tuple(filter_sizes),
                               filter_num=filter_num, w_len=w_len, tile_n=tile_n)

    in_specs = [
        pl.BlockSpec((tile_n, w_len, D_bert), lambda n: (n, 0, 0)),
        pl.BlockSpec((tile_n, w_len, 1), lambda n: (n, 0, 0)),
    ]
    args = [word_p, mask_p]
    for k, wk in zip(filter_sizes, params["conv_w"]):
        in_specs.append(pl.BlockSpec((k, D_bert, filter_num), lambda n: (0, 0, 0)))
        args.append(wk.astype(jnp.bfloat16))
    for bk in params["conv_b"]:
        in_specs.append(pl.BlockSpec((1, filter_num), lambda n: (0, 0)))
        args.append(bk)
    in_specs += [pl.BlockSpec((total, d_pad), lambda n: (0, 0)),
                 pl.BlockSpec((1, d_pad), lambda n: (0, 0))]
    args += [fc_w, fc_b]

    out = pl.pallas_call(
        kernel,
        out_shape=jax.ShapeDtypeStruct((n_pad, d_pad), jnp.float32),
        grid=(n_pad // tile_n,),
        in_specs=in_specs,
        out_specs=pl.BlockSpec((tile_n, d_pad), lambda n: (n, 0)),
        compiler_params=pltpu.CompilerParams(dimension_semantics=("parallel",)),
    )(*args)
    return out[:N, :D_cnn]


# ---------------------------------------------------------------------------
# Kernel B: dense single-head GATConv (edge-masked softmax) -> ReLU,
#           tiled over target-row blocks (parallel grid axis)
# ---------------------------------------------------------------------------
def _gat_kernel(xfull_ref, xblk_ref, adj_ref, wg_ref, bg_ref,
                asrc_ref, adst_ref, out_ref):
    neg = jnp.float32(-1e30)
    wg = wg_ref[...].astype(jnp.bfloat16)
    xp = jnp.dot(xfull_ref[...].astype(jnp.bfloat16), wg,
                 preferred_element_type=jnp.float32)                    # (Nn, H)
    xp_blk = jnp.dot(xblk_ref[...].astype(jnp.bfloat16), wg,
                     preferred_element_type=jnp.float32)                # (TM, H)

    # GATConv (heads=1): e_ij = LeakyReLU(a_dst.x'_i + a_src.x'_j)
    a_s_row = lax.dot_general(asrc_ref[...], xp, (((1,), (1,)), ((), ())),
                              preferred_element_type=jnp.float32)       # (1, Nn)
    a_d_col = lax.dot_general(xp_blk, adst_ref[...], (((1,), (1,)), ((), ())),
                              preferred_element_type=jnp.float32)       # (TM, 1)
    adj = adj_ref[...]                                                  # (TM, Nn)
    e = a_d_col + a_s_row
    e = jnp.where(e > 0, e, 0.2 * e)                                    # LeakyReLU(0.2)
    e = jnp.where(adj > 0, e, neg)                                      # edge mask
    e = e - jnp.max(e, axis=-1, keepdims=True)
    p = jnp.exp(e) * adj
    p = p * pl.reciprocal(jnp.sum(p, axis=-1, keepdims=True), approx=True)
    h = jnp.dot(p.astype(jnp.bfloat16), xp.astype(jnp.bfloat16),
                preferred_element_type=jnp.float32) + bg_ref[...]
    out_ref[...] = jnp.maximum(h, 0.0)                                  # (TM, H)


def gat_conv(node_x, adj, params, *, tm=GAT_TM):
    Nn, D = node_x.shape
    H = params["gat_w"].shape[1]
    return pl.pallas_call(
        _gat_kernel,
        out_shape=jax.ShapeDtypeStruct((Nn, H), jnp.float32),
        grid=(Nn // tm,),
        in_specs=[
            pl.BlockSpec((Nn, D), lambda i: (0, 0)),     # all node features
            pl.BlockSpec((tm, D), lambda i: (i, 0)),     # target-row block
            pl.BlockSpec((tm, Nn), lambda i: (i, 0)),    # adjacency row block
            pl.BlockSpec((D, H), lambda i: (0, 0)),
            pl.BlockSpec((1, H), lambda i: (0, 0)),
            pl.BlockSpec((1, H), lambda i: (0, 0)),
            pl.BlockSpec((1, H), lambda i: (0, 0)),
        ],
        out_specs=pl.BlockSpec((tm, H), lambda i: (i, 0)),
        compiler_params=pltpu.CompilerParams(dimension_semantics=("parallel",)),
    )(node_x, node_x, adj, params["gat_w"], params["gat_b"],
      params["gat_asrc"], params["gat_adst"])


# ---------------------------------------------------------------------------
# Kernel C: graph readout (global max/sum pool -> MLP -> log_softmax)
# ---------------------------------------------------------------------------
def _readout_kernel(feat_ref, bone_ref, bone_col_ref, wlin_ref, blin_ref,
                    wsm_ref, bsm_ref, out_ref):
    neg = jnp.float32(-1e30)
    feat = feat_ref[...]                                                 # (Nn, H)
    # global_sum_pool: one MXU matmul with the {0,1} membership matrix
    sum_feat = jnp.dot(bone_ref[...].astype(jnp.bfloat16),
                       feat.astype(jnp.bfloat16),
                       preferred_element_type=jnp.float32)               # (B, H)
    # global_max_pool: vectorized masked reduction over the node axis
    masked = jnp.where(bone_col_ref[...] > 0, feat[None, :, :], neg)     # (B, Nn, H)
    max_feat = jnp.max(masked, axis=1)                                   # (B, H)

    cat = jnp.concatenate([max_feat, sum_feat], axis=-1).astype(jnp.bfloat16)
    hidden = jnp.maximum(
        jnp.dot(cat, wlin_ref[...].astype(jnp.bfloat16),
                preferred_element_type=jnp.float32) + blin_ref[...], 0.0)
    logits = jnp.dot(hidden.astype(jnp.bfloat16), wsm_ref[...].astype(jnp.bfloat16),
                     preferred_element_type=jnp.float32) + bsm_ref[...]
    lmax = jnp.max(logits, axis=-1, keepdims=True)
    lse = lmax + jnp.log(jnp.sum(jnp.exp(logits - lmax), axis=-1, keepdims=True))
    out_ref[...] = logits - lse                                          # log_softmax


def graph_readout(feat, bone, params):
    B = bone.shape[0]
    C = params["smax_w"].shape[1]
    bone_col = bone[:, :, None]                       # (B, Nn, 1) for the max-pool mask
    args = (feat, bone, bone_col, params["lin_w"], params["lin_b"],
            params["smax_w"], params["smax_b"])
    return pl.pallas_call(
        _readout_kernel,
        out_shape=jax.ShapeDtypeStruct((B, C), jnp.float32),
        in_specs=[pl.BlockSpec(memory_space=pltpu.MemorySpace.VMEM) for _ in args],
        out_specs=pl.BlockSpec(memory_space=pltpu.MemorySpace.VMEM),
    )(*args)


# ---------------------------------------------------------------------------
# Glue: graph construction (pure Python restructuring, mirrors the torch code)
# ---------------------------------------------------------------------------
def graph_construction(features, role, seq_length, graph_edge):
    speaker_type_map = [[0, 1], [2, 3]]
    assert len(graph_edge) == features.shape[0]
    node_feats, edges, edge_type, graph_batch = [], [], [], []
    node_sum = 0
    for i in range(features.shape[0]):
        L = int(seq_length[i])
        node_feats.append(features[i, :L, :])
        for src, tgt in graph_edge[i]:
            edges.append((src + node_sum, tgt + node_sum))
            edge_type.append(speaker_type_map[role[i][src]][role[i][tgt]])
        node_sum += L
        graph_batch.extend([i] * L)
    node_features = jnp.concatenate(node_feats, axis=0)
    edge_index = np.array(edges, dtype=np.int32).T      # (2, E): row0=src, row1=tgt
    edge_type = np.array(edge_type, dtype=np.int32)     # unused by the GATConv branch
    graph_batch = np.array(graph_batch, dtype=np.int32)
    return node_features, edge_index, edge_type, graph_batch


def build_dense_graph(edge_index, graph_batch, num_nodes, batch_size):
    n_pad = -(-num_nodes // NODE_BUCKET) * NODE_BUCKET   # fixed lane-aligned bucket
    adj = np.eye(n_pad, dtype=np.float32)                # add_self_loops=True
    if edge_index.size:
        src, tgt = edge_index
        adj[tgt, src] = 1.0                              # message src -> tgt
    bone = np.zeros((batch_size, n_pad), dtype=np.float32)
    bone[graph_batch, np.arange(num_nodes)] = 1.0
    return jnp.asarray(adj), jnp.asarray(bone), n_pad


# ---------------------------------------------------------------------------
# Parameters (deterministic synthetic init)
# ---------------------------------------------------------------------------
def init_params(key, vocab, D_bert, filter_sizes, filter_num, D_cnn, D_graph, C):
    def nrm(k, shape, scale):
        return (scale * jax.random.normal(k, shape)).astype(jnp.float32)

    keys = iter(jax.random.split(key, 32))
    p = {}
    p["embed"] = nrm(next(keys), (vocab, D_bert), 0.1)
    p["conv_w"] = [nrm(next(keys), (k, D_bert, filter_num), 1.0 / np.sqrt(D_bert * k))
                   for k in filter_sizes]
    p["conv_b"] = [nrm(next(keys), (1, filter_num), 0.01) for _ in filter_sizes]
    total = len(filter_sizes) * filter_num
    p["fc_w"] = nrm(next(keys), (total, D_cnn), 1.0 / np.sqrt(total))
    p["fc_b"] = nrm(next(keys), (1, D_cnn), 0.01)
    p["gat_w"] = nrm(next(keys), (D_cnn, D_graph), 1.0 / np.sqrt(D_cnn))
    p["gat_b"] = nrm(next(keys), (1, D_graph), 0.01)
    p["gat_asrc"] = nrm(next(keys), (1, D_graph), 0.1)
    p["gat_adst"] = nrm(next(keys), (1, D_graph), 0.1)
    p["lin_w"] = nrm(next(keys), (2 * D_graph, D_graph), 1.0 / np.sqrt(2 * D_graph))
    p["lin_b"] = nrm(next(keys), (1, D_graph), 0.01)
    p["smax_w"] = nrm(next(keys), (D_graph, C), 1.0 / np.sqrt(D_graph))
    p["smax_b"] = nrm(next(keys), (1, C), 0.01)
    return p


# ---------------------------------------------------------------------------
# End-to-end forward
# ---------------------------------------------------------------------------
def bughunter_forward(params, input_ids, token_type_ids, attention_mask,
                      role, seq_length, graph_edge, *,
                      filter_sizes, filter_num, D_cnn, batch_size):
    b, s, w_len = input_ids.shape
    i_ids = input_ids.reshape(-1, w_len)
    a_ids = attention_mask.reshape(-1, w_len)

    # TODO(synk): pretrained BertModel replaced by a deterministic embedding lookup
    # (full BERT has no in-script checkpoint); token_type_ids unused by the stand-in.
    word_output = jnp.take(params["embed"], i_ids, axis=0)        # (N, w, D_bert)
    mask = a_ids.astype(jnp.float32)[..., None]                   # (N, w, 1)

    features = cnn_encode(word_output, mask, params, filter_sizes, filter_num, D_cnn)
    features = features.reshape(b, s, -1)

    node_features, edge_index, edge_type, graph_batch = graph_construction(
        features, role, seq_length, graph_edge)
    num_nodes = node_features.shape[0]
    adj, bone, n_pad = build_dense_graph(edge_index, graph_batch, num_nodes, batch_size)
    node_x = jnp.pad(node_features, ((0, n_pad - num_nodes), (0, 0)))

    feat = gat_conv(node_x, adj, params)
    return graph_readout(feat, bone, params)


if __name__ == "__main__":
    key = jax.random.PRNGKey(0)
    b, s, w = 2, 4, 16
    vocab = 64
    D_bert, filter_num, D_cnn, D_graph, C = 32, 16, 32, 32, 2
    filter_sizes = (2, 3)

    kp, kd = jax.random.split(key)
    params = init_params(kp, vocab, D_bert, filter_sizes, filter_num, D_cnn, D_graph, C)

    k1, k2 = jax.random.split(kd)
    input_ids = jax.random.randint(k1, (b, s, w), 0, vocab, dtype=jnp.int32)
    token_type_ids = jnp.zeros((b, s, w), jnp.int32)
    attention_mask = (jax.random.uniform(k2, (b, s, w)) > 0.2).astype(jnp.int32)
    attention_mask = attention_mask.at[..., 0].set(1)

    role = [[0, 1, 0, 1], [1, 0, 1, 0]]
    seq_length = [3, 4]
    graph_edge = [[(0, 1), (1, 2), (0, 2)],
                  [(0, 1), (1, 2), (2, 3), (0, 3)]]

    log_prob = bughunter_forward(params, input_ids, token_type_ids, attention_mask,
                                 role, seq_length, graph_edge,
                                 filter_sizes=filter_sizes, filter_num=filter_num,
                                 D_cnn=D_cnn, batch_size=b)
    log_prob = jax.block_until_ready(log_prob)
    assert log_prob.shape == (b, C)
    assert bool(jnp.all(jnp.isfinite(log_prob)))
    print("KERNEL_OK")
</pallas_src>

<mosaic_0001>
module attributes {stable_mosaic.version = 11 : i64} {
  func.func @_cnn_kernel(%arg0: i32, %arg1: memref<16x16x32xf32, #tpu.memory_space<vmem>>, %arg2: memref<16x16x1xf32, #tpu.memory_space<vmem>>, %arg3: memref<2x32x16xbf16, #tpu.memory_space<vmem>>, %arg4: memref<3x32x16xbf16, #tpu.memory_space<vmem>>, %arg5: memref<1x16xf32, #tpu.memory_space<vmem>>, %arg6: memref<1x16xf32, #tpu.memory_space<vmem>>, %arg7: memref<32x128xbf16, #tpu.memory_space<vmem>>, %arg8: memref<1x128xf32, #tpu.memory_space<vmem>>, %arg9: memref<16x128xf32, #tpu.memory_space<vmem>>) attributes {dimension_semantics = [#tpu.dimension_semantics<parallel>], iteration_bounds = array<i64: 1>, scalar_prefetch = 0 : i64, scratch_operands = 0 : i64, tpu.core_type = #tpu.core_type<tc>, window_params = [{transform_indices = @transform_0, window_bounds = array<i64: 16, 16, 32>}, {transform_indices = @transform_1, window_bounds = array<i64: 16, 16, 1>}, {pipeline_mode = #tpu.pipeline_mode<synchronous>, transform_indices = @transform_2, window_bounds = array<i64: 2, 32, 16>}, {pipeline_mode = #tpu.pipeline_mode<synchronous>, transform_indices = @transform_3, window_bounds = array<i64: 3, 32, 16>}, {pipeline_mode = #tpu.pipeline_mode<synchronous>, transform_indices = @transform_4, window_bounds = array<i64: 1, 16>}, {pipeline_mode = #tpu.pipeline_mode<synchronous>, transform_indices = @transform_5, window_bounds = array<i64: 1, 16>}, {pipeline_mode = #tpu.pipeline_mode<synchronous>, transform_indices = @transform_6, window_bounds = array<i64: 32, 128>}, {pipeline_mode = #tpu.pipeline_mode<synchronous>, transform_indices = @transform_7, window_bounds = array<i64: 1, 128>}, {transform_indices = @transform_8, window_bounds = array<i64: 16, 128>}]} {
    %c0 = arith.constant 0 : index
    %c0_0 = arith.constant 0 : index
    %c0_1 = arith.constant 0 : index
    %0 = vector.load %arg1[%c0, %c0_0, %c0_1] : memref<16x16x32xf32, #tpu.memory_space<vmem>>, vector<16x16x32xf32>
    %c0_2 = arith.constant 0 : index
    %c0_3 = arith.constant 0 : index
    %c0_4 = arith.constant 0 : index
    %1 = vector.load %arg2[%c0_2, %c0_3, %c0_4] : memref<16x16x1xf32, #tpu.memory_space<vmem>>, vector<16x16x1xf32>
    %2 = vector.broadcast %1 : vector<16x16x1xf32> to vector<16x16x32xf32>
    %3 = arith.mulf %0, %2 : vector<16x16x32xf32>
    %4 = vector.shape_cast %3 : vector<16x16x32xf32> to vector<256x32xf32>
    %5 = arith.truncf %4 : vector<256x32xf32> to vector<256x32xbf16>
    %c255_i32 = arith.constant 255 : i32
    %6 = tpu.dynamic_rotate %4 by %c255_i32 dim 0 : vector<256x32xf32>, i32 -> vector<256x32xf32>
    %7 = arith.truncf %6 : vector<256x32xf32> to vector<256x32xbf16>
    %c254_i32 = arith.constant 254 : i32
    %8 = tpu.dynamic_rotate %4 by %c254_i32 dim 0 : vector<256x32xf32>, i32 -> vector<256x32xf32>
    %9 = arith.truncf %8 : vector<256x32xf32> to vector<256x32xbf16>
    %10 = tpu.iota {dimensions = array<i32: 1>} : vector<16x16x1xi32>
    %cst = arith.constant 0.000000e+00 : f32
    %11 = vector.broadcast %cst : f32 to vector<256x16xf32>
    %c0_5 = arith.constant 0 : index
    %c0_6 = arith.constant 0 : index
    %c0_7 = arith.constant 0 : index
    %12 = vector.load %arg3[%c0_5, %c0_6, %c0_7] : memref<2x32x16xbf16, #tpu.memory_space<vmem>>, vector<1x32x16xbf16>
    %13 = vector.shape_cast %12 : vector<1x32x16xbf16> to vector<32x16xbf16>
    %cst_8 = arith.constant dense<0.000000e+00> : vector<256x16xf32>
    %14 = tpu.matmul %5, %13, %cst_8 {dimension_numbers = #tpu.dot_dimension_numbers<[1], [0], [0], [1], [0, 0, 1, 1], [], []>} : vector<256x32xbf16>, vector<32x16xbf16>, vector<256x16xf32> -> vector<256x16xf32>
    %15 = arith.addf %11, %14 : vector<256x16xf32>
    %c1 = arith.constant 1 : index
    %c0_9 = arith.constant 0 : index
    %c0_10 = arith.constant 0 : index
    %16 = vector.load %arg3[%c1, %c0_9, %c0_10] : memref<2x32x16xbf16, #tpu.memory_space<vmem>>, vector<1x32x16xbf16>
    %17 = vector.shape_cast %16 : vector<1x32x16xbf16> to vector<32x16xbf16>
    %cst_11 = arith.constant dense<0.000000e+00> : vector<256x16xf32>
    %18 = tpu.matmul %7, %17, %cst_11 {dimension_numbers = #tpu.dot_dimension_numbers<[1], [0], [0], [1], [0, 0, 1, 1], [], []>} : vector<256x32xbf16>, vector<32x16xbf16>, vector<256x16xf32> -> vector<256x16xf32>
    %19 = arith.addf %15, %18 : vector<256x16xf32>
    %c0_12 = arith.constant 0 : index
    %c0_13 = arith.constant 0 : index
    %20 = vector.load %arg5[%c0_12, %c0_13] : memref<1x16xf32, #tpu.memory_space<vmem>>, vector<1x16xf32>
    %21 = vector.broadcast %20 : vector<1x16xf32> to vector<256x16xf32>
    %22 = arith.addf %19, %21 : vector<256x16xf32>
    %cst_14 = arith.constant 0.000000e+00 : f32
    %23 = vector.broadcast %cst_14 : f32 to vector<256x16xf32>
    %24 = arith.maximumf %22, %23 : vector<256x16xf32>
    %25 = vector.shape_cast %24 : vector<256x16xf32> to vector<16x16x16xf32>
    %c15_i32 = arith.constant 15 : i32
    %26 = vector.broadcast %c15_i32 : i32 to vector<16x16x1xi32>
    %27 = arith.cmpi slt, %10, %26 : vector<16x16x1xi32>
    %cst_15 = arith.constant -1.000000e+00 : f32
    %28 = vector.shape_cast %27 : vector<16x16x1xi1> to vector<16x16x1xi1>
    %29 = vector.broadcast %28 : vector<16x16x1xi1> to vector<16x16x16xi1>
    %30 = vector.broadcast %cst_15 : f32 to vector<16x16x16xf32>
    %31 = arith.select %29, %25, %30 : vector<16x16x16xi1>, vector<16x16x16xf32>
    %cst_16 = arith.constant dense<0xFF800000> : vector<16x16xf32>
    %32 = vector.multi_reduction <maximumf>, %31, %cst_16 [1] : vector<16x16x16xf32> to vector<16x16xf32>
    %cst_17 = arith.constant 0.000000e+00 : f32
    %33 = vector.broadcast %cst_17 : f32 to vector<256x16xf32>
    %c0_18 = arith.constant 0 : index
    %c0_19 = arith.constant 0 : index
    %c0_20 = arith.constant 0 : index
    %34 = vector.load %arg4[%c0_18, %c0_19, %c0_20] : memref<3x32x16xbf16, #tpu.memory_space<vmem>>, vector<1x32x16xbf16>
    %35 = vector.shape_cast %34 : vector<1x32x16xbf16> to vector<32x16xbf16>
    %cst_21 = arith.constant dense<0.000000e+00> : vector<256x16xf32>
    %36 = tpu.matmul %5, %35, %cst_21 {dimension_numbers = #tpu.dot_dimension_numbers<[1], [0], [0], [1], [0, 0, 1, 1], [], []>} : vector<256x32xbf16>, vector<32x16xbf16>, vector<256x16xf32> -> vector<256x16xf32>
    %37 = arith.addf %33, %36 : vector<256x16xf32>
    %c1_22 = arith.constant 1 : index
    %c0_23 = arith.constant 0 : index
    %c0_24 = arith.constant 0 : index
    %38 = vector.load %arg4[%c1_22, %c0_23, %c0_24] : memref<3x32x16xbf16, #tpu.memory_space<vmem>>, vector<1x32x16xbf16>
    %39 = vector.shape_cast %38 : vector<1x32x16xbf16> to vector<32x16xbf16>
    %cst_25 = arith.constant dense<0.000000e+00> : vector<256x16xf32>
    %40 = tpu.matmul %7, %39, %cst_25 {dimension_numbers = #tpu.dot_dimension_numbers<[1], [0], [0], [1], [0, 0, 1, 1], [], []>} : vector<256x32xbf16>, vector<32x16xbf16>, vector<256x16xf32> -> vector<256x16xf32>
    %41 = arith.addf %37, %40 : vector<256x16xf32>
    %c2 = arith.constant 2 : index
    %c0_26 = arith.constant 0 : index
    %c0_27 = arith.constant 0 : index
    %42 = vector.load %arg4[%c2, %c0_26, %c0_27] : memref<3x32x16xbf16, #tpu.memory_space<vmem>>, vector<1x32x16xbf16>
    %43 = vector.shape_cast %42 : vector<1x32x16xbf16> to vector<32x16xbf16>
    %cst_28 = arith.constant dense<0.000000e+00> : vector<256x16xf32>
    %44 = tpu.matmul %9, %43, %cst_28 {dimension_numbers = #tpu.dot_dimension_numbers<[1], [0], [0], [1], [0, 0, 1, 1], [], []>} : vector<256x32xbf16>, vector<32x16xbf16>, vector<256x16xf32> -> vector<256x16xf32>
    %45 = arith.addf %41, %44 : vector<256x16xf32>
    %c0_29 = arith.constant 0 : index
    %c0_30 = arith.constant 0 : index
    %46 = vector.load %arg6[%c0_29, %c0_30] : memref<1x16xf32, #tpu.memory_space<vmem>>, vector<1x16xf32>
    %47 = vector.broadcast %46 : vector<1x16xf32> to vector<256x16xf32>
    %48 = arith.addf %45, %47 : vector<256x16xf32>
    %cst_31 = arith.constant 0.000000e+00 : f32
    %49 = vector.broadcast %cst_31 : f32 to vector<256x16xf32>
    %50 = arith.maximumf %48, %49 : vector<256x16xf32>
    %51 = vector.shape_cast %50 : vector<256x16xf32> to vector<16x16x16xf32>
    %c14_i32 = arith.constant 14 : i32
    %52 = vector.broadcast %c14_i32 : i32 to vector<16x16x1xi32>
    %53 = arith.cmpi slt, %10, %52 : vector<16x16x1xi32>
    %cst_32 = arith.constant -1.000000e+00 : f32
    %54 = vector.shape_cast %53 : vector<16x16x1xi1> to vector<16x16x1xi1>
    %55 = vector.broadcast %54 : vector<16x16x1xi1> to vector<16x16x16xi1>
    %56 = vector.broadcast %cst_32 : f32 to vector<16x16x16xf32>
    %57 = arith.select %55, %51, %56 : vector<16x16x16xi1>, vector<16x16x16xf32>
    %cst_33 = arith.constant dense<0xFF800000> : vector<16x16xf32>
    %58 = vector.multi_reduction <maximumf>, %57, %cst_33 [1] : vector<16x16x16xf32> to vector<16x16xf32>
    %59 = tpu.concatenate %32, %58 in 1 : vector<16x16xf32>, vector<16x16xf32> -> vector<16x32xf32>
    %60 = arith.truncf %59 : vector<16x32xf32> to vector<16x32xbf16>
    %c0_34 = arith.constant 0 : index
    %c0_35 = arith.constant 0 : index
    %61 = vector.load %arg7[%c0_34, %c0_35] : memref<32x128xbf16, #tpu.memory_space<vmem>>, vector<32x128xbf16>
    %cst_36 = arith.constant dense<0.000000e+00> : vector<16x128xf32>
    %62 = tpu.matmul %60, %61, %cst_36 {dimension_numbers = #tpu.dot_dimension_numbers<[1], [0], [0], [1], [0, 0, 1, 1], [], []>} : vector<16x32xbf16>, vector<32x128xbf16>, vector<16x128xf32> -> vector<16x128xf32>
    %c0_37 = arith.constant 0 : index
    %c0_38 = arith.constant 0 : index
    %63 = vector.load %arg8[%c0_37, %c0_38] : memref<1x128xf32, #tpu.memory_space<vmem>>, vector<1x128xf32>
    %64 = vector.broadcast %63 : vector<1x128xf32> to vector<16x128xf32>
    %65 = arith.addf %62, %64 : vector<16x128xf32>
    %cst_39 = arith.constant 0.000000e+00 : f32
    %66 = vector.broadcast %cst_39 : f32 to vector<16x128xf32>
    %67 = arith.maximumf %65, %66 : vector<16x128xf32>
    %c0_40 = arith.constant 0 : index
    %c0_41 = arith.constant 0 : index
    %68 = vector.load %arg9[%c0_40, %c0_41] : memref<16x128xf32, #tpu.memory_space<vmem>>, vector<16x128xf32>
    tpu.vector_store %arg9[%c0_40, %c0_41], %67 {strides = array<i32>} : memref<16x128xf32, #tpu.memory_space<vmem>>, vector<16x128xf32>,
    return
  }
  func.func @transform_0(%arg0: i32) -> (i32, i32, i32) {
    %c0_i32 = arith.constant 0 : i32
    %c0_i32_0 = arith.constant 0 : i32
    %c0_i32_1 = arith.constant 0 : i32
    return %arg0, %c0_i32, %c0_i32_0 : i32, i32, i32
  }
  func.func @transform_1(%arg0: i32) -> (i32, i32, i32) {
    %c0_i32 = arith.constant 0 : i32
    %c0_i32_0 = arith.constant 0 : i32
    %c0_i32_1 = arith.constant 0 : i32
    return %arg0, %c0_i32, %c0_i32_0 : i32, i32, i32
  }
  func.func @transform_2(%arg0: i32) -> (i32, i32, i32) {
    %c0_i32 = arith.constant 0 : i32
    %c0_i32_0 = arith.constant 0 : i32
    %c0_i32_1 = arith.constant 0 : i32
    %c0_i32_2 = arith.constant 0 : i32
    return %c0_i32, %c0_i32_0, %c0_i32_1 : i32, i32, i32
  }
  func.func @transform_3(%arg0: i32) -> (i32, i32, i32) {
    %c0_i32 = arith.constant 0 : i32
    %c0_i32_0 = arith.constant 0 : i32
    %c0_i32_1 = arith.constant 0 : i32
    %c0_i32_2 = arith.constant 0 : i32
    return %c0_i32, %c0_i32_0, %c0_i32_1 : i32, i32, i32
  }
  func.func @transform_4(%arg0: i32) -> (i32, i32) {
    %c0_i32 = arith.constant 0 : i32
    %c0_i32_0 = arith.constant 0 : i32
    %c0_i32_1 = arith.constant 0 : i32
    return %c0_i32, %c0_i32_0 : i32, i32
  }
  func.func @transform_5(%arg0: i32) -> (i32, i32) {
    %c0_i32 = arith.constant 0 : i32
    %c0_i32_0 = arith.constant 0 : i32
    %c0_i32_1 = arith.constant 0 : i32
    return %c0_i32, %c0_i32_0 : i32, i32
  }
  func.func @transform_6(%arg0: i32) -> (i32, i32) {
    %c0_i32 = arith.constant 0 : i32
    %c0_i32_0 = arith.constant 0 : i32
    %c0_i32_1 = arith.constant 0 : i32
    return %c0_i32, %c0_i32_0 : i32, i32
  }
  func.func @transform_7(%arg0: i32) -> (i32, i32) {
    %c0_i32 = arith.constant 0 : i32
    %c0_i32_0 = arith.constant 0 : i32
    %c0_i32_1 = arith.constant 0 : i32
    return %c0_i32, %c0_i32_0 : i32, i32
  }
  func.func @transform_8(%arg0: i32) -> (i32, i32) {
    %c0_i32 = arith.constant 0 : i32
    %c0_i32_0 = arith.constant 0 : i32
    return %arg0, %c0_i32 : i32, i32
  }
}

</mosaic_0001>

<bundles_post_ra>
// kernel: tpu_custom_call.1
= control target key start
LH: loop header
LB: loop body
LE: loop exit
PB: predicated region body
PF: predicated region fallthrough
CT: control target
= control target key end

     0   :  { %v2014_v3 = vmov 0   ;;  %s3298_s0 = inlined_call_operand.vmem [shape: f32[16,16,32], index: 0, kind: input, shape index: {}]   ;;  %s3299_s1 = inlined_call_operand.vmem [shape: f32[16,16,1], index: 1, kind: input, shape index: {}]   ;;  %s3300_s2 = inlined_call_operand.vmem [shape: bf16[2,32,16], index: 2, kind: input, shape index: {}]   ;;  %s3301_s3 = inlined_call_operand.vmem [shape: bf16[3,32,16], index: 3, kind: input, shape index: {}]   ;;  %s3302_s4 = inlined_call_operand.vmem [shape: f32[1,16], index: 4, kind: input, shape index: {}]   ;;  %s3303_s5 = inlined_call_operand.vmem [shape: f32[1,16], index: 5, kind: input, shape index: {}]   ;;  %s3304_s6 = inlined_call_operand.vmem [shape: bf16[32,128], index: 6, kind: input, shape index: {}]   ;;  %s3305_s7 = inlined_call_operand.vmem [shape: f32[1,128], index: 7, kind: input, shape index: {}]   ;;  %s3306_s8 = inlined_call_operand.hbm [shape: f32[16,128], index: 8, kind: output, shape index: {}]  }
   0x1   :  { %v86_v0 = vld [vmem:[%s3299_s1 + $0xb8] sm:$0xff]  ;;  %v77_v1 = vld [vmem:[%s3299_s1 + $0x70] sm:$0xff]  ;;  %v75_v2 = vld [vmem:[%s3299_s1 + $0x60] sm:$0xff]  ;;  %1977 = vset.pattern.permute.xlu2 %v2014_v3  ;;  %1976 = vset.pattern.permute.xlu1 %v2014_v3 }
   0x2   :  { %1975 = vset.pattern.permute.xlu0 %v2014_v3  ;;  %212 = vperm.xlu2 %1977, %v86_v0  }
   0x3   :  { %167 = vperm.xlu1 %1976, %v77_v1   ;;  %157 = vperm.xlu0 %1975, %v75_v2  }
   0x4   :  { %13 = vsyncpa [#allocation3], 0  ;;  %v87_v4 = vld [vmem:[%s3299_s1 + $0xc0] sm:$0xff]  ;;  %v85_v5 = vld [vmem:[%s3299_s1 + $0xb0] sm:$0xff]  ;;  %v335_v36 = vlaneseq  ;;  %vm489_vm2 = vcmask 261120   ;;  %vm882_vm4 = vcmask 130048  }
   0x5   :  { %v76_v6 = vld [vmem:[%s3299_s1 + $0x68] sm:$0xff]  ;;  %v65_v7 = vld [vmem:[%s3299_s1 + $0x10] sm:$0xff]  ;;  %v63_v9 = vld [vmem:[%s3299_s1] sm:$0xff]  ;;  %vm1690_vm6 = vcmask 1041409   ;;  %vm1692_vm7 = vcmask 1042434   ;;  %vm1694_vm8 = vcmask 1043459  }
   0x6   :  { %v64_v8 = vld [vmem:[%s3299_s1 + $0x8] sm:$0xff]  ;;  %v79_v11 = vld [vmem:[%s3299_s1 + $0x80] sm:$0xff]  ;;  %v78_v12 = vld [vmem:[%s3299_s1 + $0x78] sm:$0xff]  ;;  %v2172_v40 = vshrl.u32 %v335_v36, 7  ;;  %vm1696_vm9 = vcmask 1044484   ;;  %vm1698_vm10 = vcmask 1045509  }
   0x7   :  { %v88_v10 = vld [vmem:[%s3299_s1 + $0xc8] sm:$0xff]  ;;  %v67_v13 = vld [vmem:[%s3299_s1 + $0x20] sm:$0xff]  ;;  %v66_v14 = vld [vmem:[%s3299_s1 + $0x18] sm:$0xff]  ;;  %vm1700_vm11 = vcmask 1046534   ;;  %vm1702_vm12 = vcmask 1047559   ;;  %s2016_s25 = smov [#allocation2]  }
   0x8   :  { %v89_v15 = vld [vmem:[%s3299_s1 + $0xd0] sm:$0xff]  ;;  %v90_v16 = vld [vmem:[%s3299_s1 + $0xd8] sm:$0xff]  ;;  %v80_v18 = vld [vmem:[%s3299_s1 + $0x88] sm:$0xff]  ;;  %vm418_vm0 = vcmp.lt.s32.totalorder %v2172_v40, 6  ;;  %vm337_vm1 = vcmp.lt.s32.totalorder %v2172_v40, 7  ;;  %s1797_s26 = sshll.u32 %s2016_s25, 4  ;;  %s1798_s26 = int_to_ptr.vmem [resolvable:$true] %s1797_s26 }
   0x9   :  { %v81_v17 = vld [vmem:[%s3299_s1 + $0x90] sm:$0xff]  ;;  %v68_v20 = vld [vmem:[%s3299_s1 + $0x28] sm:$0xff]  ;;  %v91_v21 = vld [vmem:[%s3299_s1 + $0xe0] sm:$0xff]  ;;  %s1799_s28 = sshll.u32 %s3306_s8, 4  ;;  %s2017_s29 = smov 128   ;;  %s1800_s28 = int_to_ptr.hbm [resolvable:$true] %s1799_s28 }
   0xa   :  { %217 = vperm.xlu2 %1977, %v87_v4   ;;  %v69_v19 = vld [vmem:[%s3299_s1 + $0x30] sm:$0xff]  ;;  %v92_v22 = vld [vmem:[%s3299_s1 + $0xe8] sm:$0xff]  ;;  %v83_v23 = vld [vmem:[%s3299_s1 + $0xa0] sm:$0xff] }
   0xb   :  { %207 = vperm.xlu1 %1976, %v85_v5   ;;  %162 = vperm.xlu0 %1975, %v76_v6   ;;  %v82_v24 = vld [vmem:[%s3299_s1 + $0x98] sm:$0xff]  ;;  %v71_v25 = vld [vmem:[%s3299_s1 + $0x40] sm:$0xff]  ;;  %v93_v27 = vld [vmem:[%s3299_s1 + $0xf0] sm:$0xff] }
   0xc   :  { %v70_v26 = vld [vmem:[%s3299_s1 + $0x38] sm:$0xff]  ;;  %v72_v28 = vld [vmem:[%s3299_s1 + $0x48] sm:$0xff]  ;;  %v73_v32 = vld [vmem:[%s3299_s1 + $0x50] sm:$0xff] }
   0xd   :  { %v94_v29 = vld [vmem:[%s3299_s1 + $0xf8] sm:$0xff]  ;;  %v84_v30 = vld [vmem:[%s3299_s1 + $0xa8] sm:$0xff]  ;;  %v1954_v38 = vld [vmem:[%s3300_s2 + $0x10] sm:$0xff] }
   0xe   :  { %v74_v31 = vld [vmem:[%s3299_s1 + $0x58] sm:$0xff]  ;;  %v55_v39 = vld [vmem:[%s3298_s0 + $0xc0] sm:$0xff]  ;;  %v1957_v46 = vld [vmem:[%s3301_s3 + $0x8] sm:$0xff] }
   0xf   :  { %v1955_v34 = vld [vmem:[%s3300_s2 + $0x18] sm:$0xff]  ;;  %v1961_v49 = vld [vmem:[%s3301_s3 + $0x28] sm:$0xff]  ;;  %v45_v55 = vld [vmem:[%s3298_s0 + $0x70] sm:$0xff] }
  0x10   :  { %v54_v35 = vld [vmem:[%s3298_s0 + $0xb8] sm:$0xff]  ;;  %1965 = vmatpush.bf16.msra.mxu2 %v1955_v34  ;;  %1966 = vmatpush.bf16.msra.mxu3 %v1955_v34  ;;  %v56_v50 = vld [vmem:[%s3298_s0 + $0xc8] sm:$0xff]  ;;  %v43_v58 = vld [vmem:[%s3298_s0 + $0x60] sm:$0xff] }
  0x11   :  { %544 = vmatpush.bf16.msra.mxu0 %v1955_v34  ;;  %1964 = vmatpush.bf16.msra.mxu1 %v1955_v34  ;;  %v1959_v45 = vld [vmem:[%s3301_s3 + $0x18] sm:$0xff]  ;;  %v53_v0 = vld [vmem:[%s3298_s0 + $0xb0] sm:$0xff]  ;;  %v44_v1 = vld [vmem:[%s3298_s0 + $0x68] sm:$0xff] }
  0x12   :  { %107 = vperm.xlu2 %1977, %v65_v7   ;;  %v33_v5 = vld [vmem:[%s3298_s0 + $0x10] sm:$0xff] }
  0x13   :  { %102 = vperm.xlu1 %1976, %v64_v8   ;;  %97 = vperm.xlu0 %1975, %v63_v9  }
  0x14   :  { %1968 = vmatpush.bf16.msra.mxu2 %v1954_v38  ;;  %1969 = vmatpush.bf16.msra.mxu3 %v1954_v38 }
  0x15   :  { %545 = vmatpush.bf16.msra.mxu0 %v1954_v38  ;;  %1967 = vmatpush.bf16.msra.mxu1 %v1954_v38 }
  0x18   :  { %1054 = vmatpush.bf16.msrb.mxu2 %v1959_v45  ;;  %1155 = vmatpush.bf16.msrb.mxu3 %v1957_v46 }
  0x19   :  { %1309 = vmatpush.bf16.msrb.mxu0 %v1961_v49 }
  0x1a   :  { %222 = vperm.xlu2 %1977, %v88_v10  }
  0x1b   :  { %177 = vperm.xlu1 %1976, %v79_v11   ;;  %172 = vperm.xlu0 %1975, %v78_v12  }
  0x22   :  { %117 = vperm.xlu2 %1977, %v67_v13  }
  0x23   :  { %112 = vperm.xlu1 %1976, %v66_v14   ;;  %227 = vperm.xlu0 %1975, %v89_v15  }
  0x2a   :  { %232 = vperm.xlu2 %1977, %v90_v16  }
  0x2b   :  { %187 = vperm.xlu1 %1976, %v81_v17   ;;  %182 = vperm.xlu0 %1975, %v80_v18  }
  0x32   :  { %127 = vperm.xlu2 %1977, %v69_v19  }
  0x33   :  { %122 = vperm.xlu1 %1976, %v68_v20   ;;  %237 = vperm.xlu0 %1975, %v91_v21  }
  0x3a   :  { %242 = vperm.xlu2 %1977, %v92_v22  }
  0x3b   :  { %197 = vperm.xlu1 %1976, %v83_v23   ;;  %192 = vperm.xlu0 %1975, %v82_v24   ;;  %v32_v24 = vld [vmem:[%s3298_s0 + $0x8] sm:$0xff] }
  0x42   :  { %137 = vperm.xlu2 %1977, %v71_v25   ;;  %v31_v25 = vld [vmem:[%s3298_s0] sm:$0xff] }
  0x43   :  { %132 = vperm.xlu1 %1976, %v70_v26   ;;  %247 = vperm.xlu0 %1975, %v93_v27  }
  0x4a   :  { %142 = vperm.xlu2 %1977, %v72_v28  }
  0x4b   :  { %252 = vperm.xlu1 %1976, %v94_v29   ;;  %202 = vperm.xlu0 %1975, %v84_v30  }
  0x53   :  { %152 = vperm.xlu1 %1976, %v74_v31   ;;  %147 = vperm.xlu0 %1975, %v73_v32  }
  0x5c   :  { %v213_v33 = vpop.permute.xlu2 %212 }
  0x5d   :  { %v278_v37 = vmul.f32 %v213_v33, %v54_v35 }
  0x5f   :  { %v409_v42 = vrot.slane %v278_v37, 2  ;;  %v326_v61 = vrot.slane %v278_v37, 1 }
  0x64   :  { %v218_v41 = vpop.permute.xlu2 %217 }
  0x65   :  { %v2174_v43 = vmul.f32 %v218_v41, %v55_v39 }
  0x67   :  { %v410_v44 = vrot.slane %v2174_v43, 2  ;;  %v327_v62 = vrot.slane %v2174_v43, 1 }
  0x69   :  { %v2186_v47 = vsel %vm418_vm0, %v409_v42, %v410_v44  ;;  %v345_v11 = vsel %vm337_vm1, %v326_v61, %v327_v62 }
  0x6a   :  { %3336 = vst [vmem:[#allocation5_spill] sm:$0xff] %v2186_v47 }
  0x6c   :  { %v108_v48 = vpop.permute.xlu2 %107 }
  0x6d   :  { %v2244_v16 = vmul.f32 %v108_v48, %v33_v5 }
  0x6f   :  { %v388_v38 = vrot.slane %v2244_v16, 2 }
  0x74   :  { %v223_v51 = vpop.permute.xlu2 %222 }
  0x75   :  { %v168_v52 = vpop.permute.xlu1 %167  ;;  %v158_v53 = vpop.permute.xlu0 %157  ;;  %v2194_v54 = vmul.f32 %v223_v51, %v56_v50  ;;  %v47_v50 = vld [vmem:[%s3298_s0 + $0x80] sm:$0xff]  ;;  %v46_v51 = vld [vmem:[%s3298_s0 + $0x78] sm:$0xff] }
  0x76   :  { %v2213_v60 = vmul.f32 %v168_v52, %v45_v55  ;;  %v2216_v63 = vmul.f32 %v158_v53, %v43_v58  ;;  %v36_v58 = vld [vmem:[%s3298_s0 + $0x28] sm:$0xff] }
  0x77   :  { %v2201_v56 = vpack.c.bf16 %v2194_v54, %v2174_v43  ;;  %v411_v57 = vrot.slane %v2194_v54, 2 }
  0x78   :  { %v317_v6 = vrot.slane %v2213_v60, 1  ;;  %v400_v9 = vrot.slane %v2213_v60, 2  ;;  %v3308_v10 = vrot.slane %v2216_v63, 1  ;;  %v3307_v17 = vrot.slane %v2216_v63, 2 }
  0x79   :  { %3337 = vst [vmem:[#allocation6_spill] sm:$0xff] %v2201_v56  ;;  %v2211_v59 = vsel %vm418_vm0, %v410_v44, %v411_v57 }
  0x7a   :  { %3338 = vst [vmem:[#allocation7_spill] sm:$0xff] %v2211_v59 }
  0x7c   :  { %v2224_v2 = vpop.permute.xlu2 %117 }
  0x7d   :  { %v208_v3 = vpop.permute.xlu1 %207  ;;  %v163_v4 = vpop.permute.xlu0 %162 }
  0x7e   :  { %v2231_v7 = vmul.f32 %v208_v3, %v53_v0  ;;  %v268_v8 = vmul.f32 %v163_v4, %v44_v1  ;;  %v35_v4 = vld [vmem:[%s3298_s0 + $0x20] sm:$0xff] }
  0x80   :  { %v2240_v12 = vpack.c.bf16 %v278_v37, %v2231_v7  ;;  %v3312_v13 = vrot.slane %v2231_v7, 1  ;;  %v3311_v14 = vrot.slane %v2231_v7, 2  ;;  %v316_v15 = vrot.slane %v268_v8, 1 }
  0x81   :  { %v399_v18 = vrot.slane %v268_v8, 2  ;;  %v2248_v19 = vpack.c.bf16 %v268_v8, %v2216_v63  ;;  %v305_v37 = vrot.slane %v2244_v16, 1 }
  0x82   :  { %3339 = vst [vmem:[#allocation8_spill] sm:$0xff] %v2240_v12  ;;  %v355_v20 = vsel %vm337_vm1, %v316_v15, %v317_v6  ;;  %v356_v21 = vsel %vm337_vm1, %v3308_v10, %v316_v15  ;;  %v346_v22 = vsel %vm337_vm1, %v3312_v13, %v326_v61  ;;  %v2266_v23 = vsel %vm418_vm0, %v3311_v14, %v409_v42 }
  0x83   :  { %3340 = vst [vmem:[#allocation9_spill] sm:$0xff] %v2266_v23  ;;  %v2274_v26 = vpack.c.bf16 %v355_v20, %v356_v21  ;;  %v2276_v27 = vpack.c.bf16 %v345_v11, %v346_v22  ;;  %v2282_v28 = vsel %vm418_vm0, %v399_v18, %v400_v9  ;;  %v2288_v29 = vsel %vm418_vm0, %v3307_v17, %v399_v18  ;;  %v1958_v18 = vld [vmem:[%s3301_s3 + $0x10] sm:$0xff]  ;;  %v1956_v20 = vld [vmem:[%s3301_s3] sm:$0xff] }
  0x84   :  { %v233_v30 = vpop.permute.xlu2 %232  ;;  %1055 = vmatpush.bf16.msrb.mxu2 %v1958_v18  ;;  %1156 = vmatpush.bf16.msrb.mxu3 %v1956_v20  ;;  %v1960_v18 = vld [vmem:[%s3301_s3 + $0x20] sm:$0xff] }
  0x85   :  { %3341 = vst [vmem:[#allocation10_spill] sm:$0xff] %v2276_v27  ;;  %v103_v33 = vpop.permute.xlu1 %102  ;;  %v98_v34 = vpop.permute.xlu0 %97  ;;  %1829 = vmatmul.msk.bf16.vlgmr.msra.gmra.mxu2 %vm489_vm2, %v2274_v26  ;;  %1834 = vmatmul.msk.bf16.vlgmr.msra.gmra.mxu3 %vm489_vm2, %v2276_v27 }
  0x86   :  { %v256_v35 = vmul.f32 %v103_v33, %v32_v24  ;;  %v2298_v36 = vmul.f32 %v98_v34, %v31_v25  ;;  %v2370_v33 = vmul.f32 %v2224_v2, %v35_v4  ;;  %v58_v34 = vld [vmem:[%s3298_s0 + $0xd8] sm:$0xff]  ;;  %1310 = vmatpush.bf16.msrb.mxu0 %v1960_v18 }
  0x88   :  { %v304_v39 = vrot.slane %v256_v35, 1  ;;  %v387_v41 = vrot.slane %v256_v35, 2  ;;  %v2303_v42 = vpack.c.bf16 %v256_v35, %v2298_v36  ;;  %v3309_v44 = vrot.slane %v2298_v36, 1  ;;  %v34_v35 = vld [vmem:[%s3298_s0 + $0x18] sm:$0xff] }
  0x89   :  { %v3310_v45 = vrot.slane %v2298_v36, 2 }
  0x8a   :  { %v367_v46 = vsel %vm337_vm1, %v304_v39, %v305_v37  ;;  %v368_v48 = vsel %vm337_vm1, %v3309_v44, %v304_v39  ;;  %v2317_v49 = vsel %vm418_vm0, %v387_v41, %v388_v38 }
  0x8b   :  { %v2325_v52 = vpack.c.bf16 %v367_v46, %v368_v48  ;;  %v2331_v53 = vsel %vm418_vm0, %v3310_v45, %v387_v41  ;;  %v328_v48 = vrot.slane %v2194_v54, 1 }
  0x8c   :  { %v2333_v55 = vpop.permute.xlu2 %127 }
  0x8d   :  { %v178_v61 = vpop.permute.xlu1 %177  ;;  %v173_v0 = vpop.permute.xlu0 %172  ;;  %1823 = vmatmul.msk.bf16.vlgmr.msra.gmra.mxu0 %vm489_vm2, %v2325_v52 }
  0x8e   :  { %v2339_v1 = vmul.f32 %v178_v61, %v47_v50  ;;  %v270_v3 = vmul.f32 %v173_v0, %v46_v51  ;;  %v2394_v61 = vmul.f32 %v233_v30, %v58_v34  ;;  %v390_v30 = vrot.slane %v2370_v33, 2 }
  0x90   :  { %v319_v5 = vrot.slane %v2339_v1, 1  ;;  %v402_v8 = vrot.slane %v2339_v1, 2  ;;  %v318_v11 = vrot.slane %v270_v3, 1  ;;  %v401_v15 = vrot.slane %v270_v3, 2 }
  0x91   :  { %v2353_v21 = vpack.c.bf16 %v270_v3, %v2213_v60  ;;  %v307_v60 = vrot.slane %v2370_v33, 1  ;;  %v413_v34 = vrot.slane %v2394_v61, 2 }
  0x92   :  { %v353_v22 = vsel %vm337_vm1, %v318_v11, %v319_v5  ;;  %v354_v24 = vsel %vm337_vm1, %v317_v6, %v318_v11  ;;  %v2367_v25 = vsel %vm418_vm0, %v401_v15, %v402_v8  ;;  %v57_v6 = vld [vmem:[%s3298_s0 + $0xd0] sm:$0xff]  ;;  %v2387_v2 = vsel %vm418_vm0, %v400_v9, %v401_v15 }
  0x93   :  { %v2381_v39 = vpack.c.bf16 %v353_v22, %v354_v24  ;;  %v344_v22 = vsel %vm337_vm1, %v327_v62, %v328_v48  ;;  %v49_v62 = vld [vmem:[%s3298_s0 + $0x90] sm:$0xff] }
  0x94   :  { %v243_v41 = vpop.permute.xlu2 %242 }
  0x95   :  { %v113_v50 = vpop.permute.xlu1 %112  ;;  %v228_v51 = vpop.permute.xlu0 %227  ;;  %1830 = vmatmul.msk.bf16.gmra.mxu2 %vm489_vm2, %v2381_v39 }
  0x96   :  { %v258_v0 = vmul.f32 %v113_v50, %v34_v35  ;;  %v2396_v3 = vmul.f32 %v228_v51, %v57_v6  ;;  %v48_v50 = vld [vmem:[%s3298_s0 + $0x88] sm:$0xff] }
  0x98   :  { %v306_v9 = vrot.slane %v258_v0, 1  ;;  %v389_v4 = vrot.slane %v258_v0, 2  ;;  %v2401_v11 = vpack.c.bf16 %v2394_v61, %v2396_v3  ;;  %v329_v15 = vrot.slane %v2396_v3, 1 }
  0x99   :  { %v412_v20 = vrot.slane %v2396_v3, 2  ;;  %v2414_v24 = vpack.c.bf16 %v258_v0, %v2244_v16 }
  0x9a   :  { %3342 = vst [vmem:[#allocation11_spill] sm:$0xff] %v2401_v11  ;;  %v365_v35 = vsel %vm337_vm1, %v306_v9, %v307_v60  ;;  %v366_v6 = vsel %vm337_vm1, %v305_v37, %v306_v9  ;;  %v343_v43 = vsel %vm337_vm1, %v328_v48, %v329_v15  ;;  %v2441_v37 = vsel %vm418_vm0, %v389_v4, %v390_v30 }
  0x9b   :  { %v2433_v51 = vpack.c.bf16 %v365_v35, %v366_v6  ;;  %v2435_v0 = vpack.c.bf16 %v343_v43, %v344_v22  ;;  %v2447_v48 = vsel %vm418_vm0, %v388_v38, %v389_v4  ;;  %v2455_v22 = vsel %vm418_vm0, %v411_v57, %v412_v20  ;;  %v37_v57 = vld [vmem:[%s3298_s0 + $0x30] sm:$0xff] }
  0x9c   :  { %v138_v9 = vpop.permute.xlu2 %137  ;;  %3344 = vst [vmem:[#allocation13_spill] sm:$0xff] %v2455_v22  ;;  %v2461_v35 = vsel %vm418_vm0, %v412_v20, %v413_v34  ;;  %v39_v20 = vld [vmem:[%s3298_s0 + $0x40] sm:$0xff]  ;;  %v2480_v18 = vmul.f32 %v2333_v55, %v37_v57 }
  0x9d   :  { %3343 = vst [vmem:[#allocation12_spill] sm:$0xff] %v2435_v0  ;;  %v188_v16 = vpop.permute.xlu1 %187  ;;  %v183_v6 = vpop.permute.xlu0 %182  ;;  %1824 = vmatmul.msk.bf16.gmra.mxu0 %vm489_vm2, %v2433_v51  ;;  %1835 = vmatmul.msk.bf16.gmra.mxu3 %vm489_vm2, %v2435_v0 }
  0x9e   :  { %3345 = vst [vmem:[#allocation14_spill] sm:$0xff] %v2461_v35  ;;  %v2472_v38 = vmul.f32 %v188_v16, %v49_v62  ;;  %v272_v4 = vmul.f32 %v183_v6, %v48_v50  ;;  %v60_v62 = vld [vmem:[%s3298_s0 + $0xe8] sm:$0xff]  ;;  %v3317_v44 = vrot.slane %v2480_v18, 1 }
  0x9f   :  { %v40_v50 = vld [vmem:[%s3298_s0 + $0x48] sm:$0xff]  ;;  %v2523_v10 = vmul.f32 %v243_v41, %v60_v62 }
  0xa0   :  { %v3314_v43 = vrot.slane %v2472_v38, 1  ;;  %v3313_v32 = vrot.slane %v2472_v38, 2  ;;  %v320_v46 = vrot.slane %v272_v4, 1  ;;  %v403_v31 = vrot.slane %v272_v4, 2 }
  0xa1   :  { %v2483_v54 = vpack.c.bf16 %v272_v4, %v2339_v1  ;;  %v2511_v4 = vmul.f32 %v138_v9, %v39_v20  ;;  %v330_v20 = vrot.slane %v2394_v61, 1 }
  0xa2   :  { %v351_v16 = vsel %vm337_vm1, %v320_v46, %v3314_v43  ;;  %v352_v55 = vsel %vm337_vm1, %v319_v5, %v320_v46  ;;  %v2503_v6 = vsel %vm418_vm0, %v403_v31, %v3313_v32  ;;  %v2509_v57 = vsel %vm418_vm0, %v402_v8, %v403_v31  ;;  %v59_v5 = vld [vmem:[%s3298_s0 + $0xe0] sm:$0xff] }
  0xa3   :  { %v2519_v46 = vpack.c.bf16 %v351_v16, %v352_v55  ;;  %v3318_v55 = vrot.slane %v2480_v18, 2  ;;  %v3316_v17 = vrot.slane %v2511_v4, 2  ;;  %v342_v43 = vsel %vm337_vm1, %v329_v15, %v330_v20 }
  0xa4   :  { %v143_v1 = vpop.permute.xlu2 %142  ;;  %v311_v11 = vrot.slane %v2511_v4, 1 }
  0xa5   :  { %v2525_v31 = vmul.f32 %v143_v1, %v40_v50  ;;  %v123_v8 = vpop.permute.xlu1 %122  ;;  %v238_v9 = vpop.permute.xlu0 %237  ;;  %1831 = vmatmul.msk.bf16.gmra.mxu2 %vm489_vm2, %v2519_v46 }
  0xa6   :  { %v260_v45 = vmul.f32 %v123_v8, %v36_v58  ;;  %v283_v16 = vmul.f32 %v238_v9, %v59_v5 }
  0xa7   :  { %v3315_v41 = vrot.slane %v2525_v31, 2  ;;  %v2536_v62 = vpack.c.bf16 %v2525_v31, %v2511_v4 }
  0xa8   :  { %v308_v50 = vrot.slane %v260_v45, 1  ;;  %v391_v1 = vrot.slane %v260_v45, 2  ;;  %v2539_v14 = vpack.c.bf16 %v2523_v10, %v283_v16  ;;  %v331_v13 = vrot.slane %v283_v16, 1 }
  0xa9   :  { %v414_v58 = vrot.slane %v283_v16, 2  ;;  %v2543_v5 = vpack.c.bf16 %v260_v45, %v2370_v33  ;;  %v2551_v8 = vsel %vm418_vm0, %v3316_v17, %v3315_v41  ;;  %v51_v41 = vld [vmem:[%s3298_s0 + $0xa0] sm:$0xff]  ;;  %v50_v17 = vld [vmem:[%s3298_s0 + $0x98] sm:$0xff] }
  0xaa   :  { %3346 = vst [vmem:[#allocation15_spill] sm:$0xff] %v2539_v14  ;;  %v363_v9 = vsel %vm337_vm1, %v308_v50, %v3317_v44  ;;  %v364_v16 = vsel %vm337_vm1, %v307_v60, %v308_v50  ;;  %v341_v45 = vsel %vm337_vm1, %v330_v20, %v331_v13  ;;  %v2581_v3 = vsel %vm418_vm0, %v391_v1, %v3318_v55 }
  0xab   :  { %v2573_v44 = vpack.c.bf16 %v363_v9, %v364_v16  ;;  %v2575_v32 = vpack.c.bf16 %v341_v45, %v342_v43  ;;  %v2587_v60 = vsel %vm418_vm0, %v390_v30, %v391_v1  ;;  %v2595_v43 = vsel %vm418_vm0, %v413_v34, %v414_v58 }
  0xac   :  { %3348 = vst [vmem:[#allocation17_spill] sm:$0xff] %v2595_v43  ;;  %v3349_v20 = vrot.slane %v2523_v10, 2  ;;  %v3351_v55 = vrot.slane %v2472_v38, 1  ;;  %v332_v43 = vrot.slane %v2523_v10, 1 }
  0xad   :  { %3347 = vst [vmem:[#allocation16_spill] sm:$0xff] %v2575_v32  ;;  %v198_v33 = vpop.permute.xlu1 %197  ;;  %v193_v9 = vpop.permute.xlu0 %192  ;;  %1825 = vmatmul.msk.bf16.gmra.mxu0 %vm489_vm2, %v2573_v44  ;;  %1836 = vmatmul.msk.bf16.gmra.mxu3 %vm489_vm2, %v2575_v32 }
  0xae   :  { %v2601_v50 = vsel %vm418_vm0, %v414_v58, %v3349_v20  ;;  %v2609_v30 = vmul.f32 %v198_v33, %v51_v41  ;;  %v274_v34 = vmul.f32 %v193_v9, %v50_v17  ;;  %v3352_v41 = vrot.slane %v2472_v38, 2  ;;  %v38_v9 = vld [vmem:[%s3298_s0 + $0x38] sm:$0xff] }
  0xaf   :  { %3350 = vst [vmem:[#allocation18_spill] sm:$0xff] %v2601_v50  ;;  %v340_v22 = vsel %vm337_vm1, %v331_v13, %v332_v43  ;;  %v62_v13 = vld [vmem:[%s3298_s0 + $0xf8] sm:$0xff] }
  0xb0   :  { %v323_v1 = vrot.slane %v2609_v30, 1  ;;  %v406_v16 = vrot.slane %v2609_v30, 2  ;;  %v322_v58 = vrot.slane %v274_v34, 1  ;;  %v405_v45 = vrot.slane %v274_v34, 2 }
  0xb1   :  { %v2614_v20 = vpack.c.bf16 %v274_v34, %v2472_v38  ;;  %v61_v34 = vld [vmem:[%s3298_s0 + $0xf0] sm:$0xff]  ;;  %v1953_v38 = vld [vmem:[%s3300_s2 + $0x8] sm:$0xff] }
  0xb2   :  { %v349_v15 = vsel %vm337_vm1, %v322_v58, %v323_v1  ;;  %v350_v61 = vsel %vm337_vm1, %v3351_v55, %v322_v58  ;;  %v2624_v17 = vsel %vm418_vm0, %v405_v45, %v406_v16  ;;  %v2630_v33 = vsel %vm418_vm0, %v3352_v41, %v405_v45  ;;  %693 = vmatpush.bf16.msrb.mxu1 %v1953_v38 }
  0xb3   :  { %v2638_v14 = vpack.c.bf16 %v349_v15, %v350_v61  ;;  %v1952_v15 = vld [vmem:[%s3300_s2] sm:$0xff]  ;;  %v3354_v38 = vrot.slane %v2511_v4, 2  ;;  %s2018_s2 = smov 8  }
  0xb5   :  { %v133_v58 = vpop.permute.xlu1 %132  ;;  %v248_v35 = vpop.permute.xlu0 %247  ;;  %1832 = vmatmul.msk.bf16.gmra.mxu2 %vm489_vm2, %v2638_v14 }
  0xb6   :  { %v262_v45 = vmul.f32 %v133_v58, %v38_v9  ;;  %v285_v41 = vmul.f32 %v248_v35, %v61_v34  ;;  %v3353_v9 = vrot.slane %v2480_v18, 1  ;;  %694 = vmatpush.bf16.msrb.mxu1 %v1952_v15 }
  0xb8   :  { %v310_v61 = vrot.slane %v262_v45, 1  ;;  %v393_v55 = vrot.slane %v262_v45, 2  ;;  %v333_v32 = vrot.slane %v285_v41, 1  ;;  %v416_v59 = vrot.slane %v285_v41, 2 }
  0xb9   :  { %v2655_v56 = vpack.c.bf16 %v262_v45, %v2480_v18  ;;  %v52_v45 = vld [vmem:[%s3298_s0 + $0xa8] sm:$0xff] }
  0xba   :  { %v361_v35 = vsel %vm337_vm1, %v310_v61, %v311_v11  ;;  %v362_v34 = vsel %vm337_vm1, %v3353_v9, %v310_v61  ;;  %v339_v58 = vsel %vm337_vm1, %v332_v43, %v333_v32  ;;  %v2669_v0 = vsel %vm418_vm0, %v393_v55, %v3354_v38 }
  0xbb   :  { %v2677_v23 = vpack.c.bf16 %v361_v35, %v362_v34  ;;  %v2679_v61 = vpack.c.bf16 %v339_v58, %v340_v22  ;;  %v3356_v43 = vrot.slane %v2480_v18, 2  ;;  %v3357_v9 = vrot.slane %v2523_v10, 2 }
  0xbc   :  { %v3360_v22 = vrot.slane %v2231_v7, 1 }
  0xbd   :  { %3355 = vst [vmem:[#allocation19_spill] sm:$0xff] %v2679_v61  ;;  %v2685_v4 = vsel %vm418_vm0, %v3356_v43, %v393_v55  ;;  %v2691_v38 = vsel %vm418_vm0, %v3357_v9, %v416_v59  ;;  %v253_v35 = vpop.permute.xlu1 %252  ;;  %v203_v15 = vpop.permute.xlu0 %202  ;;  %1826 = vmatmul.msk.bf16.gmra.mxu0 %vm489_vm2, %v2677_v23  ;;  %1837 = vmatmul.msk.bf16.gmra.mxu3 %vm489_vm2, %v2679_v61 }
  0xbe   :  { %3358 = vst [vmem:[#allocation20_spill] sm:$0xff] %v2691_v38  ;;  %v286_v18 = vmul.f32 %v253_v35, %v62_v13  ;;  %v276_v10 = vmul.f32 %v203_v15, %v52_v45  ;;  %v42_v13 = vld [vmem:[%s3298_s0 + $0x58] sm:$0xff] }
  0xc0   :  { %v2701_v55 = vpack.c.bf16 %v286_v18, %v285_v41  ;;  %v417_v34 = vrot.slane %v286_v18, 2  ;;  %v324_v58 = vrot.slane %v276_v10, 1  ;;  %v407_v43 = vrot.slane %v276_v10, 2  ;;  %v41_v41 = vld [vmem:[%s3298_s0 + $0x50] sm:$0xff] }
  0xc1   :  { %v2704_v9 = vpack.c.bf16 %v276_v10, %v2609_v30  ;;  %v3361_v30 = vrot.slane %v2231_v7, 2  ;;  %v334_v10 = vrot.slane %v286_v18, 1 }
  0xc2   :  { %3359 = vst [vmem:[#allocation21_spill] sm:$0xff] %v2701_v55  ;;  %v347_v47 = vsel %vm337_vm1, %v324_v58, %v3360_v22  ;;  %v348_v50 = vsel %vm337_vm1, %v323_v1, %v324_v58  ;;  %v2728_v22 = vsel %vm418_vm0, %v406_v16, %v407_v43  ;;  %v2734_v15 = vsel %vm418_vm0, %v416_v59, %v417_v34 }
  0xc3   :  { %v2718_v45 = vpack.c.bf16 %v347_v47, %v348_v50  ;;  %v2724_v35 = vsel %vm418_vm0, %v407_v43, %v3361_v30  ;;  %v3362_v47 = vrot.slane %v2298_v36, 2  ;;  %v312_v50 = vrot.slane %v2525_v31, 1 }
  0xc4   :  { %v338_v18 = vsel %vm337_vm1, %v333_v32, %v334_v10 }
  0xc5   :  { %v2740_v7 = vsel %vm418_vm0, %v417_v34, %v3362_v47  ;;  %v153_v58 = vpop.permute.xlu1 %152  ;;  %v148_v30 = vpop.permute.xlu0 %147  ;;  %1833 = vmatmul.msk.bf16.gmra.mxu2 %vm489_vm2, %v2718_v45  ;;  %v360_v34 = vsel %vm337_vm1, %v311_v11, %v312_v50  ;;  %v3363_v47 = vrot.slane %v2298_v36, 1 }
  0xc6   :  { %v266_v43 = vmul.f32 %v153_v58, %v42_v13  ;;  %v265_v59 = vmul.f32 %v148_v30, %v41_v41  ;;  %v3364_v41 = vrot.slane %v2216_v63, 1  ;;  %v3365_v30 = vrot.slane %v2525_v31, 2 }
  0xc7   :  { %v369_v12 = vsel %vm337_vm1, %v334_v10, %v3363_v47 }
  0xc8   :  { %v314_v1 = vrot.slane %v266_v43, 1  ;;  %v397_v55 = vrot.slane %v266_v43, 2  ;;  %v313_v38 = vrot.slane %v265_v59, 1  ;;  %v396_v61 = vrot.slane %v265_v59, 2 }
  0xc9   :  { %v292_v27 = vpack.c.bf16 %v266_v43, %v265_v59  ;;  %v3366_v43 = vrot.slane %v2216_v63, 2  ;;  %v2772_v59 = vpack.c.bf16 %v369_v12, %v338_v18  ;;  %v3367_v63 = vpack.c.bf16 %v2317_v49, %v2331_v53 }
  0xca   :  { %v359_v13 = vsel %vm337_vm1, %v312_v50, %v313_v38  ;;  %v357_v58 = vsel %vm337_vm1, %v314_v1, %v3364_v41  ;;  %v358_v11 = vsel %vm337_vm1, %v313_v38, %v314_v1  ;;  %v440_v32 = vsel %vm418_vm0, %v3365_v30, %v396_v61 }
  0xcb   :  { %v374_v36 = vpack.c.bf16 %v359_v13, %v360_v34  ;;  %v375_v16 = vpack.c.bf16 %v357_v58, %v358_v11  ;;  %v455_v10 = vpack.c.bf16 %v440_v32, %v2551_v8  ;;  %v438_v50 = vsel %vm418_vm0, %v397_v55, %v3366_v43 }
  0xcc   :  { %v439_v47 = vsel %vm418_vm0, %v396_v61, %v397_v55  ;;  %v3368_v12 = vpack.c.bf16 %v2441_v37, %v2447_v48 }
  0xcd   :  { %1827 = vmatmul.msk.bf16.gmra.mxu0 %vm489_vm2, %v374_v36  ;;  %1828 = vmatmul.msk.bf16.vlgmr.msra.gmra.mxu1 %vm489_vm2, %v375_v16  ;;  %v456_v31 = vpack.c.bf16 %v438_v50, %v439_v47 }
  0xce   :  { %1838 = vmatmul.msk.bf16.gmra.mxu3 %vm489_vm2, %v2772_v59 }
  0xd5   :  { %1875 = vmatmul.msk.bf16.vlgmr.msrb.gmra.mxu2 %vm489_vm2, %v2325_v52 }
  0xdd   :  { %1847 = vmatmul.msk.bf16.vlgmr.msrb.gmra.mxu1 %vm489_vm2, %v2303_v42  ;;  %1927 = vmatmul.msk.bf16.vlgmr.msrb.gmra.mxu0 %vm489_vm2, %v3367_v63 }
  0xde   :  { %1899 = vmatmul.msk.bf16.vlgmr.msrb.gmra.mxu3 %vm489_vm2, %v2303_v42  ;;  %v3369_v42 = vpack.c.bf16 %v2581_v3, %v2587_v60 }
  0xe5   :  { %1876 = vmatmul.msk.bf16.gmra.mxu2 %vm489_vm2, %v2433_v51 }
  0xed   :  { %1848 = vmatmul.msk.bf16.gmra.mxu1 %vm489_vm2, %v2414_v24  ;;  %1928 = vmatmul.msk.bf16.gmra.mxu0 %vm489_vm2, %v3368_v12 }
  0xee   :  { %1900 = vmatmul.msk.bf16.gmra.mxu3 %vm489_vm2, %v2414_v24 }
  0xf5   :  { %1877 = vmatmul.msk.bf16.gmra.mxu2 %vm489_vm2, %v2573_v44  ;;  %v3370_v44 = vpack.c.bf16 %v2669_v0, %v2685_v4 }
  0xfd   :  { %1849 = vmatmul.msk.bf16.gmra.mxu1 %vm489_vm2, %v2543_v5  ;;  %1929 = vmatmul.msk.bf16.gmra.mxu0 %vm489_vm2, %v3369_v42 }
  0xfe   :  { %1901 = vmatmul.msk.bf16.gmra.mxu3 %vm489_vm2, %v2543_v5 }
 0x105   :  { %1878 = vmatmul.msk.bf16.gmra.mxu2 %vm489_vm2, %v2677_v23 }
 0x108   :  { %v2812_v49 = vpop.f32.mrf.mxu2  ;;  %v2820_v53 = vpop.f32.mrf.mxu3 }
 0x10a   :  { %v547_v52 = vpop.f32.mrf.mxu0 }
 0x10d   :  { %1850 = vmatmul.msk.bf16.gmra.mxu1 %vm489_vm2, %v2655_v56  ;;  %1930 = vmatmul.msk.bf16.gmra.mxu0 %vm489_vm2, %v3370_v44 }
 0x10e   :  { %1902 = vmatmul.msk.bf16.gmra.mxu3 %vm489_vm2, %v2655_v56 }
 0x110   :  { %v2824_v24 = vpop.f32.mrf.mxu2  ;;  %v2827_v23 = vpop.f32.mrf.mxu3 }
 0x112   :  { %v549_v51 = vpop.f32.mrf.mxu0 }
 0x115   :  { %1879 = vmatmul.msk.bf16.gmra.mxu2 %vm489_vm2, %v374_v36 }
 0x118   :  { %v2829_v37 = vpop.f32.mrf.mxu2 }
 0x11a   :  { %v2831_v48 = vpop.f32.mrf.mxu0 }
 0x11d   :  { %1851 = vmatmul.msk.bf16.gmra.mxu1 %vm489_vm2, %v2536_v62  ;;  %1931 = vmatmul.msk.bf16.gmra.mxu0 %vm489_vm2, %v455_v10  ;;  %v2921_v10 = vld [vmem:[%s3302_s4] ss:$0 sm:$0xff] }
 0x11e   :  { %1903 = vmatmul.msk.bf16.gmra.mxu3 %vm489_vm2, %v2536_v62 }
 0x120   :  { %v2838_v56 = vpop.f32.mrf.mxu2  ;;  %v2840_v0 = vpop.f32.mrf.mxu3 }
 0x122   :  { %v2842_v5 = vpop.f32.mrf.mxu0 }
 0x125   :  { %1880 = vmatmul.msk.bf16.gmra.mxu2 %vm489_vm2, %v375_v16 }
 0x128   :  { %v2845_v8 = vpop.f32.mrf.mxu2  ;;  %v2847_v3 = vpop.f32.mrf.mxu3 }
 0x12a   :  { %v2849_v60 = vpop.f32.mrf.mxu0 }
 0x12d   :  { %1852 = vmatmul.msk.bf16.gmra.mxu1 %vm489_vm2, %v292_v27  ;;  %1932 = vmatmul.msk.bf16.gmra.mxu0 %vm489_vm2, %v456_v31  ;;  %v2927_v31 = vadd.s32 8, %v2172_v40 }
 0x12e   :  { %1904 = vmatmul.msk.bf16.gmra.mxu3 %vm489_vm2, %v292_v27  ;;  %v3371_v27 = vpack.c.bf16 %v2282_v28, %v2288_v29 }
 0x12f   :  { %vm845_vm3 = vcmp.lt.s32.totalorder %v2927_v31, 15  ;;  %vm1493_vm5 = vcmp.lt.s32.totalorder %v2927_v31, 14 }
 0x130   :  { %v2854_v62 = vpop.f32.mrf.mxu2  ;;  %v2856_v61 = vpop.f32.mrf.mxu3 }
 0x132   :  { %v2858_v4 = vpop.f32.mrf.mxu0 }
 0x135   :  { %1881 = vmatmul.msk.bf16.gmra.mxu2 %vm489_vm2, %v2274_v26 }
 0x138   :  { %v2862_v38 = vpop.f32.mrf.mxu2  ;;  %v2864_v55 = vpop.f32.mrf.mxu3 }
 0x13a   :  { %v2866_v1 = vpop.f32.mrf.mxu0 }
 0x13d   :  { %1853 = vmatmul.msk.bf16.gmra.mxu1 %vm489_vm2, %v2248_v19  ;;  %1933 = vmatmul.msk.bf16.gmra.mxu0 %vm489_vm2, %v3371_v27 }
 0x13e   :  { %1905 = vmatmul.msk.bf16.gmra.mxu3 %vm489_vm2, %v2248_v19  ;;  %v3372_v19 = vpack.c.bf16 %v2367_v25, %v2387_v2 }
 0x140   :  { %v2876_v16 = vpop.f32.mrf.mxu2  ;;  %v2878_v26 = vpop.f32.mrf.mxu3 }
 0x142   :  { %v2880_v34 = vpop.f32.mrf.mxu0 }
 0x145   :  { %1882 = vmatmul.msk.bf16.gmra.mxu2 %vm489_vm2, %v2381_v39 }
 0x148   :  { %v2884_v18 = vpop.f32.mrf.mxu2  ;;  %v2886_v13 = vpop.f32.mrf.mxu3 }
 0x14a   :  { %v2888_v41 = vpop.f32.mrf.mxu0  ;;  %v2890_v28 = vpop.f32.mrf.mxu1 }
 0x14d   :  { %1854 = vmatmul.msk.bf16.gmra.mxu1 %vm489_vm2, %v2353_v21  ;;  %1934 = vmatmul.msk.bf16.gmra.mxu0 %vm489_vm2, %v3372_v19 }
 0x14e   :  { %1906 = vmatmul.msk.bf16.gmra.mxu3 %vm489_vm2, %v2353_v21  ;;  %v3373_v21 = vpack.c.bf16 %v2503_v6, %v2509_v57 }
 0x150   :  { %v2900_v29 = vpop.f32.mrf.mxu2 }
 0x151   :  { %v2902_v39 = vpop.f32.mrf.mxu3 }
 0x152   :  { %v2904_v58 = vpop.f32.mrf.mxu0  ;;  %v2906_v11 = vpop.f32.mrf.mxu1 }
 0x155   :  { %1883 = vmatmul.msk.bf16.gmra.mxu2 %vm489_vm2, %v2519_v46 }
 0x158   :  { %v1057_v30 = vpop.f32.mrf.mxu2 }
 0x159   :  { %v2910_v32 = vpop.f32.mrf.mxu3 }
 0x15a   :  { %v696_v25 = vpop.f32.mrf.mxu1  ;;  %v1312_v2 = vpop.f32.mrf.mxu0 }
 0x15b   :  { %v697_v36 = vadd.f32 %v696_v25, %v547_v52 }
 0x15d   :  { %1855 = vmatmul.msk.bf16.gmra.mxu1 %vm489_vm2, %v2483_v54  ;;  %1935 = vmatmul.msk.bf16.gmra.mxu0 %vm489_vm2, %v3373_v21  ;;  %v780_v50 = vadd.f32 %v2921_v10, %v697_v36 }
 0x15e   :  { %1907 = vmatmul.msk.bf16.gmra.mxu3 %vm489_vm2, %v2483_v54  ;;  %v2936_v54 = vld [vmem:[%s3303_s5] ss:$0 sm:$0xff] }
 0x15f   :  { %v812_v52 = vmax.f32 %v780_v50, 0.0  ;;  %v3374_v50 = vpack.c.bf16 %v2624_v17, %v2630_v33 }
 0x160   :  { %v1059_v46 = vpop.f32.mrf.mxu2 }
 0x161   :  { %v1158_v43 = vpop.f32.mrf.mxu3  ;;  %v883_v19 = vsel %vm882_vm4, %v812_v52, -inf }
 0x162   :  { %v1159_v47 = vadd.f32 %v1158_v43, %v1057_v30  ;;  %v698_v6 = vpop.f32.mrf.mxu1  ;;  %v1314_v57 = vpop.f32.mrf.mxu0 }
 0x163   :  { %v699_v63 = vadd.f32 %v698_v6, %v549_v51 }
 0x164   :  { %v1392_v12 = vadd.f32 %v1312_v2, %v1159_v47 }
 0x165   :  { %v781_v42 = vadd.f32 %v2921_v10, %v699_v63  ;;  %1884 = vmatmul.msk.bf16.gmra.mxu2 %vm489_vm2, %v2638_v14 }
 0x166   :  { %v1428_v21 = vadd.f32 %v2936_v54, %v1392_v12 }
 0x167   :  { %v813_v40 = vmax.f32 %v781_v42, 0.0 }
 0x168   :  { %v1062_v44 = vpop.f32.mrf.mxu2 }
 0x169   :  { %v851_v51 = vsel %vm845_vm3, %v813_v40, -1.0  ;;  %v1160_v27 = vpop.f32.mrf.mxu3 }
 0x16a   :  { %v884_v30 = vsel %vm882_vm4, %v851_v51, -inf  ;;  %v1161_v14 = vadd.f32 %v1160_v27, %v1059_v46  ;;  %v701_v25 = vpop.f32.mrf.mxu1  ;;  %v1317_v2 = vpop.f32.mrf.mxu0  ;;  %v1460_v46 = vmax.f32 %v1428_v21, 0.0 }
 0x16b   :  { %v885_v36 = vmax.f32 %v883_v19, %v884_v30  ;;  %v702_v6 = vadd.f32 %v701_v25, %v2831_v48 }
 0x16c   :  { %v1393_v43 = vadd.f32 %v1314_v57, %v1161_v14  ;;  %v1530_v48 = vsel %vm882_vm4, %v1460_v46, -inf }
 0x16d   :  { %1856 = vmatmul.msk.bf16.gmra.mxu1 %vm489_vm2, %v2614_v20  ;;  %1936 = vmatmul.msk.bf16.gmra.mxu0 %vm489_vm2, %v3374_v50  ;;  %v886_v42 = vrot.slane %v885_v36, 4  ;;  %v782_v17 = vadd.f32 %v2921_v10, %v702_v6 }
 0x16e   :  { %v1429_v47 = vadd.f32 %v2936_v54, %v1393_v43  ;;  %1908 = vmatmul.msk.bf16.gmra.mxu3 %vm489_vm2, %v2614_v20 }
 0x16f   :  { %v887_v25 = vmax.f32 %v885_v36, %v886_v42  ;;  %v814_v21 = vmax.f32 %v782_v17, 0.0  ;;  %v3375_v17 = vpack.c.bf16 %v2724_v35, %v2728_v22 }
 0x170   :  { %v1461_v63 = vmax.f32 %v1429_v47, 0.0  ;;  %v1064_v57 = vpop.f32.mrf.mxu2 }
 0x171   :  { %v1163_v12 = vpop.f32.mrf.mxu3  ;;  %v888_v6 = vrot.slane %v887_v25, 2  ;;  %v892_v46 = vsel %vm882_vm4, %v814_v21, -inf }
 0x172   :  { %v1499_v52 = vsel %vm1493_vm5, %v1461_v63, -1.0  ;;  %v1164_v33 = vadd.f32 %v1163_v12, %v1062_v44  ;;  %v703_v40 = vpop.f32.mrf.mxu1  ;;  %v1319_v51 = vpop.f32.mrf.mxu0 }
 0x173   :  { %v1531_v27 = vsel %vm882_vm4, %v1499_v52, -inf  ;;  %v704_v20 = vadd.f32 %v703_v40, %v2842_v5  ;;  %v889_v40 = vmax.f32 %v887_v25, %v888_v6 }
 0x174   :  { %v1532_v19 = vmax.f32 %v1530_v48, %v1531_v27  ;;  %v1394_v30 = vadd.f32 %v1317_v2, %v1164_v33 }
 0x175   :  { %v783_v14 = vadd.f32 %v2921_v10, %v704_v20  ;;  %1885 = vmatmul.msk.bf16.gmra.mxu2 %vm489_vm2, %v2718_v45 }
 0x176   :  { %v1430_v52 = vadd.f32 %v2936_v54, %v1394_v30  ;;  %v1533_v45 = vrot.slane %v1532_v19, 4 }
 0x177   :  { %v815_v43 = vmax.f32 %v783_v14, 0.0 }
 0x178   :  { %v1067_v50 = vpop.f32.mrf.mxu2  ;;  %v1462_v27 = vmax.f32 %v1430_v52, 0.0 }
 0x179   :  { %v853_v44 = vsel %vm845_vm3, %v815_v43, -1.0  ;;  %v1165_v47 = vpop.f32.mrf.mxu3 }
 0x17a   :  { %v893_v5 = vsel %vm882_vm4, %v853_v44, -inf  ;;  %v1166_v63 = vadd.f32 %v1165_v47, %v1064_v57  ;;  %v706_v2 = vpop.f32.mrf.mxu1  ;;  %v1322_v12 = vpop.f32.mrf.mxu0  ;;  %v890_v44 = vrot.slane %v889_v40, 1 }
 0x17b   :  { %v894_v33 = vmax.f32 %v892_v46, %v893_v5  ;;  %v707_v57 = vadd.f32 %v706_v2, %v2849_v60  ;;  %v1539_v60 = vsel %vm882_vm4, %v1462_v27, -inf }
 0x17c   :  { %v1395_v36 = vadd.f32 %v1319_v51, %v1166_v63  ;;  %v1534_v51 = vmax.f32 %v1532_v19, %v1533_v45  ;;  %v3376_v45 = vld [vmem:[#allocation10_spill] sm:$0xff] }
 0x17d   :  { %v895_v42 = vrot.slane %v894_v33, 4  ;;  %1857 = vmatmul.msk.bf16.gmra.mxu1 %vm489_vm2, %v2704_v9  ;;  %1937 = vmatmul.msk.bf16.gmra.mxu0 %vm489_vm2, %v3375_v17  ;;  %v784_v22 = vadd.f32 %v2921_v10, %v707_v57 }
 0x17e   :  { %v1431_v48 = vadd.f32 %v2936_v54, %v1395_v36  ;;  %1909 = vmatmul.msk.bf16.gmra.mxu3 %vm489_vm2, %v2704_v9  ;;  %v1535_v5 = vrot.slane %v1534_v51, 2 }
 0x17f   :  { %v896_v20 = vmax.f32 %v894_v33, %v895_v42  ;;  %v816_v36 = vmax.f32 %v784_v22, 0.0  ;;  %v891_v42 = vmax.f32 %v889_v40, %v890_v44 }
 0x180   :  { %v1463_v30 = vmax.f32 %v1431_v48, 0.0  ;;  %v1069_v14 = vpop.f32.mrf.mxu2  ;;  %v1536_v57 = vmax.f32 %v1534_v51, %v1535_v5  ;;  %v3378_v5 = vld [vmem:[#allocation5_spill] sm:$0xff] }
 0x181   :  { %v897_v21 = vrot.slane %v896_v20, 2  ;;  %v1168_v43 = vpop.f32.mrf.mxu3 }
 0x182   :  { %v1501_v35 = vsel %vm1493_vm5, %v1463_v30, -1.0  ;;  %v1169_v25 = vadd.f32 %v1168_v43, %v1067_v50  ;;  %v708_v47 = vpop.f32.mrf.mxu1  ;;  %v1324_v6 = vpop.f32.mrf.mxu0  ;;  %v901_v43 = vsel %vm882_vm4, %v816_v36, -inf  ;;  %v1537_v51 = vrot.slane %v1536_v57, 1 }
 0x183   :  { %v898_v46 = vmax.f32 %v896_v20, %v897_v21  ;;  %v1540_v9 = vsel %vm882_vm4, %v1501_v35, -inf  ;;  %v709_v19 = vadd.f32 %v708_v47, %v2858_v4 }
 0x184   :  { %v1541_v63 = vmax.f32 %v1539_v60, %v1540_v9  ;;  %v1396_v2 = vadd.f32 %v1322_v12, %v1169_v25 }
 0x185   :  { %v899_v52 = vrot.slane %v898_v46, 1  ;;  %v785_v33 = vadd.f32 %v2921_v10, %v709_v19  ;;  %1886 = vmatmul.msk.bf16.gmra.mxu2 %vm489_vm2, %v3376_v45  ;;  %v3377_v19 = vld [vmem:[#allocation8_spill] sm:$0xff] }
 0x186   :  { %v1542_v50 = vrot.slane %v1541_v63, 4  ;;  %v1432_v40 = vadd.f32 %v2936_v54, %v1396_v2 }
 0x187   :  { %v900_v17 = vmax.f32 %v898_v46, %v899_v52  ;;  %v817_v48 = vmax.f32 %v785_v33, 0.0 }
 0x188   :  { %v1543_v27 = vmax.f32 %v1541_v63, %v1542_v50  ;;  %v1072_v20 = vpop.f32.mrf.mxu2  ;;  %v3379_v63 = vld [vmem:[#allocation9_spill] sm:$0xff]  ;;  %v1464_v2 = vmax.f32 %v1432_v40, 0.0 }
 0x189   :  { %v1691_v4 = vsel %vm1690_vm6, %v900_v17, %v891_v42  ;;  %v855_v12 = vsel %vm845_vm3, %v817_v48, -1.0  ;;  %v1170_v30 = vpop.f32.mrf.mxu3  ;;  %v3380_v52 = vpack.c.bf16 %v3378_v5, %v3379_v63 }
 0x18a   :  { %v1544_v21 = vrot.slane %v1543_v27, 2  ;;  %v902_v35 = vsel %vm882_vm4, %v855_v12, -inf  ;;  %v1171_v25 = vadd.f32 %v1170_v30, %v1069_v14  ;;  %v711_v47 = vpop.f32.mrf.mxu1  ;;  %v1327_v22 = vpop.f32.mrf.mxu0 }
 0x18b   :  { %v903_v44 = vmax.f32 %v901_v43, %v902_v35  ;;  %v712_v45 = vadd.f32 %v711_v47, %v2866_v1 }
 0x18c   :  { %v1545_v60 = vmax.f32 %v1543_v27, %v1544_v21  ;;  %v1397_v46 = vadd.f32 %v1324_v6, %v1171_v25  ;;  %v1538_v6 = vmax.f32 %v1536_v57, %v1537_v51  ;;  %v1548_v25 = vsel %vm882_vm4, %v1464_v2, -inf }
 0x18d   :  { %v904_v9 = vrot.slane %v903_v44, 4  ;;  %1858 = vmatmul.msk.bf16.gmra.mxu1 %vm489_vm2, %v3377_v19  ;;  %1938 = vmatmul.msk.bf16.gmra.mxu0 %vm489_vm2, %v3380_v52  ;;  %v786_v30 = vadd.f32 %v2921_v10, %v712_v45 }
 0x18e   :  { %v1546_v33 = vrot.slane %v1545_v60, 1  ;;  %v1433_v14 = vadd.f32 %v2936_v54, %v1397_v46  ;;  %1910 = vmatmul.msk.bf16.gmra.mxu3 %vm489_vm2, %v3377_v19 }
 0x18f   :  { %v905_v50 = vmax.f32 %v903_v44, %v904_v9  ;;  %v3381_v9 = vld [vmem:[#allocation12_spill] sm:$0xff]  ;;  %v818_v19 = vmax.f32 %v786_v30, 0.0 }
 0x190   :  { %v1547_v36 = vmax.f32 %v1545_v60, %v1546_v33  ;;  %v1465_v42 = vmax.f32 %v1433_v14, 0.0  ;;  %v1074_v17 = vpop.f32.mrf.mxu2 }
 0x191   :  { %v906_v48 = vrot.slane %v905_v50, 2  ;;  %v1173_v27 = vpop.f32.mrf.mxu3  ;;  %v910_v2 = vsel %vm882_vm4, %v818_v19, -inf }
 0x192   :  { %v1503_v12 = vsel %vm1493_vm5, %v1465_v42, -1.0  ;;  %v1174_v21 = vadd.f32 %v1173_v27, %v1072_v20  ;;  %v713_v43 = vpop.f32.mrf.mxu1  ;;  %v1329_v35 = vpop.f32.mrf.mxu0  ;;  %v1729_v1 = vsel %vm1690_vm6, %v1547_v36, %v1538_v6 }
 0x193   :  { %v907_v47 = vmax.f32 %v905_v50, %v906_v48  ;;  %v1549_v57 = vsel %vm882_vm4, %v1503_v12, -inf  ;;  %v714_v40 = vadd.f32 %v713_v43, %v2880_v34  ;;  %v3382_v43 = vld [vmem:[#allocation6_spill] sm:$0xff] }
 0x194   :  { %v1550_v44 = vmax.f32 %v1548_v25, %v1549_v57  ;;  %v1398_v51 = vadd.f32 %v1327_v22, %v1174_v21  ;;  %v3383_v25 = vld [vmem:[#allocation13_spill] sm:$0xff] }
 0x195   :  { %v908_v60 = vrot.slane %v907_v47, 1  ;;  %v787_v46 = vadd.f32 %v2921_v10, %v714_v40  ;;  %1887 = vmatmul.msk.bf16.gmra.mxu2 %vm489_vm2, %v3381_v9 }
 0x196   :  { %v1551_v20 = vrot.slane %v1550_v44, 4  ;;  %v1434_v48 = vadd.f32 %v2936_v54, %v1398_v51 }
 0x197   :  { %v909_v5 = vmax.f32 %v907_v47, %v908_v60  ;;  %v819_v63 = vmax.f32 %v787_v46, 0.0  ;;  %v3384_v47 = vld [vmem:[#allocation7_spill] sm:$0xff] }
 0x198   :  { %v1552_v52 = vmax.f32 %v1550_v44, %v1551_v20  ;;  %v1077_v33 = vpop.f32.mrf.mxu2  ;;  %v1466_v44 = vmax.f32 %v1434_v48, 0.0 }
 0x199   :  { %v857_v14 = vsel %vm845_vm3, %v819_v63, -1.0  ;;  %v1175_v45 = vpop.f32.mrf.mxu3  ;;  %v1693_v34 = vsel %vm1692_vm7, %v909_v5, %v1691_v4  ;;  %v3385_v4 = vpack.c.bf16 %v3383_v25, %v3384_v47 }
 0x19a   :  { %v1553_v22 = vrot.slane %v1552_v52, 2  ;;  %v911_v50 = vsel %vm882_vm4, %v857_v14, -inf  ;;  %v1176_v6 = vadd.f32 %v1175_v45, %v1074_v17  ;;  %v716_v36 = vpop.f32.mrf.mxu1  ;;  %v1332_v42 = vpop.f32.mrf.mxu0  ;;  %v1557_v45 = vsel %vm882_vm4, %v1466_v44, -inf }
 0x19b   :  { %v912_v27 = vmax.f32 %v910_v2, %v911_v50  ;;  %v717_v17 = vadd.f32 %v716_v36, %v2888_v41 }
 0x19c   :  { %v1554_v12 = vmax.f32 %v1552_v52, %v1553_v22  ;;  %v1399_v30 = vadd.f32 %v1329_v35, %v1176_v6 }
 0x19d   :  { %v913_v21 = vrot.slane %v912_v27, 4  ;;  %1859 = vmatmul.msk.bf16.gmra.mxu1 %vm489_vm2, %v3382_v43  ;;  %1939 = vmatmul.msk.bf16.gmra.mxu0 %vm489_vm2, %v3385_v4  ;;  %v788_v5 = vadd.f32 %v2921_v10, %v717_v17 }
 0x19e   :  { %v1555_v57 = vrot.slane %v1554_v12, 1  ;;  %v1435_v40 = vadd.f32 %v2936_v54, %v1399_v30  ;;  %1911 = vmatmul.msk.bf16.gmra.mxu3 %vm489_vm2, %v3382_v43 }
 0x19f   :  { %v914_v51 = vmax.f32 %v912_v27, %v913_v21  ;;  %v820_v30 = vmax.f32 %v788_v5, 0.0  ;;  %v3387_v5 = vld [vmem:[#allocation11_spill] sm:$0xff] }
 0x1a0   :  { %v1556_v35 = vmax.f32 %v1554_v12, %v1555_v57  ;;  %v1467_v60 = vmax.f32 %v1435_v40, 0.0  ;;  %v1079_v46 = vpop.f32.mrf.mxu2  ;;  %v3386_v12 = vld [vmem:[#allocation16_spill] sm:$0xff] }
 0x1a1   :  { %v915_v9 = vrot.slane %v914_v51, 2  ;;  %v1178_v20 = vpop.f32.mrf.mxu3  ;;  %v919_v57 = vsel %vm882_vm4, %v820_v30, -inf }
 0x1a2   :  { %v1505_v19 = vsel %vm1493_vm5, %v1467_v60, -1.0  ;;  %v1179_v63 = vadd.f32 %v1178_v20, %v1077_v33  ;;  %v718_v52 = vpop.f32.mrf.mxu1  ;;  %v1334_v14 = vpop.f32.mrf.mxu0  ;;  %v1730_v41 = vsel %vm1692_vm7, %v1556_v35, %v1729_v1 }
 0x1a3   :  { %v916_v22 = vmax.f32 %v914_v51, %v915_v9  ;;  %v1558_v2 = vsel %vm882_vm4, %v1505_v19, -inf  ;;  %v719_v50 = vadd.f32 %v718_v52, %v2904_v58  ;;  %v3389_v52 = vld [vmem:[#allocation14_spill] sm:$0xff] }
 0x1a4   :  { %v1559_v6 = vmax.f32 %v1557_v45, %v1558_v2  ;;  %v1400_v36 = vadd.f32 %v1332_v42, %v1179_v63  ;;  %v3388_v63 = vld [vmem:[#allocation17_spill] sm:$0xff] }
 0x1a5   :  { %v917_v48 = vrot.slane %v916_v22, 1  ;;  %v789_v27 = vadd.f32 %v2921_v10, %v719_v50  ;;  %1888 = vmatmul.msk.bf16.gmra.mxu2 %vm489_vm2, %v3386_v12 }
 0x1a6   :  { %v1560_v33 = vrot.slane %v1559_v6, 4  ;;  %v1436_v35 = vadd.f32 %v2936_v54, %v1400_v36 }
 0x1a7   :  { %v918_v21 = vmax.f32 %v916_v22, %v917_v48  ;;  %v821_v1 = vmax.f32 %v789_v27, 0.0 }
 0x1a8   :  { %v1561_v43 = vmax.f32 %v1559_v6, %v1560_v33  ;;  %v1082_v25 = vpop.f32.mrf.mxu2  ;;  %v1468_v2 = vmax.f32 %v1436_v35, 0.0  ;;  %v3391_v35 = vld [vmem:[#allocation19_spill] sm:$0xff] }
 0x1a9   :  { %v859_v47 = vsel %vm845_vm3, %v821_v1, -1.0  ;;  %v1180_v4 = vpop.f32.mrf.mxu3  ;;  %v1695_v58 = vsel %vm1694_vm8, %v918_v21, %v1693_v34  ;;  %v3390_v34 = vpack.c.bf16 %v3388_v63, %v3389_v52 }
 0x1aa   :  { %v1562_v42 = vrot.slane %v1561_v43, 2  ;;  %v920_v40 = vsel %vm882_vm4, %v859_v47, -inf  ;;  %v1181_v17 = vadd.f32 %v1180_v4, %v1079_v46  ;;  %v721_v44 = vpop.f32.mrf.mxu1  ;;  %v1337_v51 = vpop.f32.mrf.mxu0 }
 0x1ab   :  { %v921_v60 = vmax.f32 %v919_v57, %v920_v40  ;;  %v722_v46 = vadd.f32 %v721_v44, %v2890_v28 }
 0x1ac   :  { %v1563_v9 = vmax.f32 %v1561_v43, %v1562_v42  ;;  %v1401_v20 = vadd.f32 %v1334_v14, %v1181_v17  ;;  %v1566_v43 = vsel %vm882_vm4, %v1468_v2, -inf }
 0x1ad   :  { %v922_v19 = vrot.slane %v921_v60, 4  ;;  %1860 = vmatmul.msk.bf16.gmra.mxu1 %vm489_vm2, %v3387_v5  ;;  %1940 = vmatmul.msk.bf16.gmra.mxu0 %vm489_vm2, %v3390_v34  ;;  %v790_v33 = vadd.f32 %v2921_v10, %v722_v46 }
 0x1ae   :  { %v1564_v45 = vrot.slane %v1563_v9, 1  ;;  %v1437_v22 = vadd.f32 %v2936_v54, %v1401_v20  ;;  %1912 = vmatmul.msk.bf16.gmra.mxu3 %vm489_vm2, %v3387_v5 }
 0x1af   :  { %v923_v50 = vmax.f32 %v921_v60, %v922_v19  ;;  %v822_v60 = vmax.f32 %v790_v33, 0.0  ;;  %v3394_v33 = vld [vmem:[#allocation18_spill] sm:$0xff] }
 0x1b0   :  { %v1565_v14 = vmax.f32 %v1563_v9, %v1564_v45  ;;  %v1469_v6 = vmax.f32 %v1437_v22, 0.0  ;;  %v1084_v36 = vpop.f32.mrf.mxu2 }
 0x1b1   :  { %v924_v48 = vrot.slane %v923_v50, 2  ;;  %v1183_v27 = vpop.f32.mrf.mxu3  ;;  %v928_v52 = vsel %vm882_vm4, %v822_v60, -inf }
 0x1b2   :  { %v1507_v12 = vsel %vm1493_vm5, %v1469_v6, -1.0  ;;  %v1184_v30 = vadd.f32 %v1183_v27, %v1082_v25  ;;  %v723_v21 = vpop.f32.mrf.mxu1  ;;  %v1339_v1 = vpop.f32.mrf.mxu0  ;;  %v1731_v28 = vsel %vm1694_vm8, %v1565_v14, %v1730_v41  ;;  %v3392_v27 = vld [vmem:[#allocation15_spill] sm:$0xff] }
 0x1b3   :  { %v925_v47 = vmax.f32 %v923_v50, %v924_v48  ;;  %v1567_v4 = vsel %vm882_vm4, %v1507_v12, -inf  ;;  %v724_v42 = vadd.f32 %v723_v21, %v2906_v11  ;;  %v3393_v12 = vld [vmem:[#allocation20_spill] sm:$0xff] }
 0x1b4   :  { %v1568_v57 = vmax.f32 %v1566_v43, %v1567_v4  ;;  %v1402_v40 = vadd.f32 %v1337_v51, %v1184_v30 }
 0x1b5   :  { %v926_v17 = vrot.slane %v925_v47, 1  ;;  %v791_v44 = vadd.f32 %v2921_v10, %v724_v42  ;;  %1889 = vmatmul.msk.bf16.gmra.mxu2 %vm489_vm2, %v3391_v35 }
 0x1b6   :  { %v1569_v25 = vrot.slane %v1568_v57, 4  ;;  %v1438_v2 = vadd.f32 %v2936_v54, %v1402_v40 }
 0x1b7   :  { %v927_v9 = vmax.f32 %v925_v47, %v926_v17  ;;  %v823_v41 = vmax.f32 %v791_v44, 0.0 }
 0x1b8   :  { %v1570_v20 = vmax.f32 %v1568_v57, %v1569_v25  ;;  %v1087_v19 = vpop.f32.mrf.mxu2  ;;  %v1470_v43 = vmax.f32 %v1438_v2, 0.0 }
 0x1b9   :  { %v861_v5 = vsel %vm845_vm3, %v823_v41, -1.0  ;;  %v1185_v63 = vpop.f32.mrf.mxu3  ;;  %v1697_v11 = vsel %vm1696_vm9, %v927_v9, %v1695_v58  ;;  %v3395_v58 = vpack.c.bf16 %v3393_v12, %v3394_v33 }
 0x1ba   :  { %v1571_v51 = vrot.slane %v1570_v20, 2  ;;  %v929_v34 = vsel %vm882_vm4, %v861_v5, -inf  ;;  %v1186_v45 = vadd.f32 %v1185_v63, %v1084_v36  ;;  %v726_v22 = vpop.f32.mrf.mxu1  ;;  %v1342_v46 = vpop.f32.mrf.mxu0  ;;  %v1575_v9 = vsel %vm882_vm4, %v1470_v43, -inf }
 0x1bb   :  { %v930_v50 = vmax.f32 %v928_v52, %v929_v34  ;;  %v727_v36 = vadd.f32 %v726_v22, %v2812_v49 }
 0x1bc   :  { %v1572_v14 = vmax.f32 %v1570_v20, %v1571_v51  ;;  %v1403_v6 = vadd.f32 %v1339_v1, %v1186_v45 }
 0x1bd   :  { %v931_v48 = vrot.slane %v930_v50, 4  ;;  %1861 = vmatmul.msk.bf16.gmra.mxu1 %vm489_vm2, %v3392_v27  ;;  %1941 = vmatmul.msk.bf16.gmra.mxu0 %vm489_vm2, %v3395_v58  ;;  %v792_v44 = vadd.f32 %v2921_v10, %v727_v36 }
 0x1be   :  { %v1573_v30 = vrot.slane %v1572_v14, 1  ;;  %v1439_v21 = vadd.f32 %v2936_v54, %v1403_v6  ;;  %1913 = vmatmul.msk.bf16.gmra.mxu3 %vm489_vm2, %v3392_v27 }
 0x1bf   :  { %v932_v47 = vmax.f32 %v930_v50, %v931_v48  ;;  %v824_v45 = vmax.f32 %v792_v44, 0.0 }
 0x1c0   :  { %v1574_v1 = vmax.f32 %v1572_v14, %v1573_v30  ;;  %v1471_v4 = vmax.f32 %v1439_v21, 0.0  ;;  %v1089_v42 = vpop.f32.mrf.mxu2 }
 0x1c1   :  { %v933_v57 = vrot.slane %v932_v47, 2  ;;  %v1188_v40 = vpop.f32.mrf.mxu3 }
 0x1c2   :  { %v1509_v17 = vsel %vm1493_vm5, %v1471_v4, -1.0  ;;  %v1189_v35 = vadd.f32 %v1188_v40, %v1087_v19  ;;  %v728_v25 = vpop.f32.mrf.mxu1  ;;  %v1344_v60 = vpop.f32.mrf.mxu0  ;;  %v1732_v49 = vsel %vm1696_vm9, %v1574_v1, %v1731_v28  ;;  %v1963_v19 = vld [vmem:[%s3304_s6 + $0x8] sm:$0xff]  ;;  %v3396_v1 = vld [vmem:[#allocation21_spill] sm:$0xff] }
 0x1c3   :  { %v934_v41 = vmax.f32 %v932_v47, %v933_v57  ;;  %v1576_v20 = vsel %vm882_vm4, %v1509_v17, -inf  ;;  %v729_v5 = vadd.f32 %v728_v25, %v2824_v24  ;;  %1781 = vmatpush.bf16.msra.mxu1 %v1963_v19 }
 0x1c4   :  { %v1577_v63 = vmax.f32 %v1575_v9, %v1576_v20  ;;  %v1404_v51 = vadd.f32 %v1342_v46, %v1189_v35 }
 0x1c5   :  { %v935_v52 = vrot.slane %v934_v41, 1  ;;  %v793_v34 = vadd.f32 %v2921_v10, %v729_v5  ;;  %1890 = vmatmul.msk.bf16.gmra.mxu2 %vm489_vm2, %v2772_v59  ;;  %v937_v59 = vsel %vm882_vm4, %v824_v45, -inf }
 0x1c6   :  { %v1578_v28 = vrot.slane %v1577_v63, 4  ;;  %v1440_v30 = vadd.f32 %v2936_v54, %v1404_v51 }
 0x1c7   :  { %v936_v22 = vmax.f32 %v934_v41, %v935_v52  ;;  %v825_v2 = vmax.f32 %v793_v34, 0.0 }
 0x1c8   :  { %v1579_v50 = vmax.f32 %v1577_v63, %v1578_v28  ;;  %v1092_v24 = vpop.f32.mrf.mxu2  ;;  %v1472_v40 = vmax.f32 %v1440_v30, 0.0 }
 0x1c9   :  { %v863_v46 = vsel %vm845_vm3, %v825_v2, -1.0  ;;  %v1190_v14 = vpop.f32.mrf.mxu3  ;;  %v1699_v6 = vsel %vm1698_vm10, %v936_v22, %v1697_v11  ;;  %v3397_v11 = vpack.c.bf16 %v2740_v7, %v2734_v15 }
 0x1ca   :  { %v1580_v48 = vrot.slane %v1579_v50, 2  ;;  %v938_v27 = vsel %vm882_vm4, %v863_v46, -inf  ;;  %v1191_v12 = vadd.f32 %v1190_v14, %v1089_v42  ;;  %v731_v33 = vpop.f32.mrf.mxu1  ;;  %v1347_v58 = vpop.f32.mrf.mxu0  ;;  %v1584_v63 = vsel %vm882_vm4, %v1472_v40, -inf }
 0x1cb   :  { %v939_v21 = vmax.f32 %v937_v59, %v938_v27  ;;  %v732_v42 = vadd.f32 %v731_v33, %v2829_v37 }
 0x1cc   :  { %v1581_v36 = vmax.f32 %v1579_v50, %v1580_v48  ;;  %v1405_v43 = vadd.f32 %v1344_v60, %v1191_v12 }
 0x1cd   :  { %v940_v47 = vrot.slane %v939_v21, 4  ;;  %1862 = vmatmul.msk.bf16.gmra.mxu1 %vm489_vm2, %v3396_v1  ;;  %1942 = vmatmul.msk.bf16.gmra.mxu0 %vm489_vm2, %v3397_v11  ;;  %v794_v7 = vadd.f32 %v2921_v10, %v732_v42 }
 0x1ce   :  { %v1582_v4 = vrot.slane %v1581_v36, 1  ;;  %v1441_v57 = vadd.f32 %v2936_v54, %v1405_v43  ;;  %1914 = vmatmul.msk.bf16.gmra.mxu3 %vm489_vm2, %v3396_v1 }
 0x1cf   :  { %v941_v17 = vmax.f32 %v939_v21, %v940_v47  ;;  %v826_v50 = vmax.f32 %v794_v7, 0.0 }
 0x1d0   :  { %v1473_v44 = vmax.f32 %v1441_v57, 0.0  ;;  %v1094_v35 = vpop.f32.mrf.mxu2  ;;  %v1583_v25 = vmax.f32 %v1581_v36, %v1582_v4 }
 0x1d1   :  { %v942_v60 = vrot.slane %v941_v17, 2  ;;  %v1193_v9 = vpop.f32.mrf.mxu3 }
 0x1d2   :  { %v1511_v15 = vsel %vm1493_vm5, %v1473_v44, -1.0  ;;  %v1194_v41 = vadd.f32 %v1193_v9, %v1092_v24  ;;  %v733_v20 = vpop.f32.mrf.mxu1  ;;  %v1349_v5 = vpop.f32.mrf.mxu0  ;;  %v1733_v37 = vsel %vm1698_vm10, %v1583_v25, %v1732_v49 }
 0x1d3   :  { %v943_v51 = vmax.f32 %v941_v17, %v942_v60  ;;  %v1585_v52 = vsel %vm882_vm4, %v1511_v15, -inf  ;;  %v734_v34 = vadd.f32 %v733_v20, %v2838_v56  ;;  %v946_v56 = vsel %vm882_vm4, %v826_v50, -inf }
 0x1d4   :  { %v1586_v19 = vmax.f32 %v1584_v63, %v1585_v52  ;;  %v1406_v28 = vadd.f32 %v1347_v58, %v1194_v41 }
 0x1d5   :  { %v944_v45 = vrot.slane %v943_v51, 1  ;;  %v795_v22 = vadd.f32 %v2921_v10, %v734_v34 }
 0x1d6   :  { %v1587_v2 = vrot.slane %v1586_v19, 4  ;;  %v1442_v36 = vadd.f32 %v2936_v54, %v1406_v28 }
 0x1d7   :  { %v945_v24 = vmax.f32 %v943_v51, %v944_v45  ;;  %v827_v46 = vmax.f32 %v795_v22, 0.0 }
 0x1d8   :  { %v1588_v14 = vmax.f32 %v1586_v19, %v1587_v2  ;;  %v1097_v48 = vpop.f32.mrf.mxu2 }
 0x1d9   :  { %v865_v49 = vsel %vm845_vm3, %v827_v46, -1.0  ;;  %v1195_v59 = vpop.f32.mrf.mxu3  ;;  %v1701_v27 = vsel %vm1700_vm11, %v945_v24, %v1699_v6  ;;  %v1474_v6 = vmax.f32 %v1442_v36, 0.0 }
 0x1da   :  { %v1589_v12 = vrot.slane %v1588_v14, 2  ;;  %v947_v33 = vsel %vm882_vm4, %v865_v49, -inf  ;;  %v1196_v58 = vadd.f32 %v1195_v59, %v1094_v35  ;;  %v736_v30 = vpop.f32.mrf.mxu1  ;;  %v1352_v21 = vpop.f32.mrf.mxu0 }
 0x1db   :  { %v948_v43 = vmax.f32 %v946_v56, %v947_v33  ;;  %v737_v57 = vadd.f32 %v736_v30, %v2845_v8  ;;  %v1593_v8 = vsel %vm882_vm4, %v1474_v6, -inf }
 0x1dc   :  { %v1590_v47 = vmax.f32 %v1588_v14, %v1589_v12  ;;  %v1407_v1 = vadd.f32 %v1349_v5, %v1196_v58 }
 0x1dd   :  { %v949_v11 = vrot.slane %v948_v43, 4  ;;  %v796_v15 = vadd.f32 %v2921_v10, %v737_v57 }
 0x1de   :  { %v1443_v4 = vadd.f32 %v2936_v54, %v1407_v1  ;;  %v1591_v42 = vrot.slane %v1590_v47, 1 }
 0x1df   :  { %v950_v40 = vmax.f32 %v948_v43, %v949_v11  ;;  %v828_v2 = vmax.f32 %v796_v15, 0.0 }
 0x1e0   :  { %v1475_v17 = vmax.f32 %v1443_v4, 0.0  ;;  %v1099_v44 = vpop.f32.mrf.mxu2  ;;  %v1592_v25 = vmax.f32 %v1590_v47, %v1591_v42 }
 0x1e1   :  { %v951_v60 = vrot.slane %v950_v40, 2  ;;  %v1198_v35 = vpop.f32.mrf.mxu3  ;;  %v955_v59 = vsel %vm882_vm4, %v828_v2, -inf }
 0x1e2   :  { %v1513_v9 = vsel %vm1493_vm5, %v1475_v17, -1.0  ;;  %v1199_v7 = vadd.f32 %v1198_v35, %v1097_v48  ;;  %v738_v41 = vpop.f32.mrf.mxu1  ;;  %v1354_v20 = vpop.f32.mrf.mxu0  ;;  %v1734_v5 = vsel %vm1700_vm11, %v1592_v25, %v1733_v37 }
 0x1e3   :  { %v952_v63 = vmax.f32 %v950_v40, %v951_v60  ;;  %v1594_v51 = vsel %vm882_vm4, %v1513_v9, -inf  ;;  %v739_v52 = vadd.f32 %v738_v41, %v2854_v62 }
 0x1e4   :  { %v1595_v34 = vmax.f32 %v1593_v8, %v1594_v51  ;;  %v1408_v19 = vadd.f32 %v1352_v21, %v1199_v7 }
 0x1e5   :  { %v953_v28 = vrot.slane %v952_v63, 1  ;;  %v797_v45 = vadd.f32 %v2921_v10, %v739_v52 }
 0x1e6   :  { %v1596_v22 = vrot.slane %v1595_v34, 4  ;;  %v1444_v30 = vadd.f32 %v2936_v54, %v1408_v19 }
 0x1e7   :  { %v829_v50 = vmax.f32 %v797_v45, 0.0  ;;  %v954_v24 = vmax.f32 %v952_v63, %v953_v28 }
 0x1e8   :  { %v1597_v46 = vmax.f32 %v1595_v34, %v1596_v22  ;;  %v1102_v14 = vpop.f32.mrf.mxu2 }
 0x1e9   :  { %v867_v37 = vsel %vm845_vm3, %v829_v50, -1.0  ;;  %v1200_v48 = vpop.f32.mrf.mxu3  ;;  %v3137_v49 = vsel %vm1702_vm12, %v954_v24, %v1701_v27  ;;  %v1476_v27 = vmax.f32 %v1444_v30, 0.0 }
 0x1ea   :  { %v1598_v62 = vrot.slane %v1597_v46, 2  ;;  %v956_v12 = vsel %vm882_vm4, %v867_v37, -inf  ;;  %v1201_v56 = vadd.f32 %v1200_v48, %v1099_v44  ;;  %v741_v33 = vpop.f32.mrf.mxu1  ;;  %v1357_v58 = vpop.f32.mrf.mxu0 }
 0x1eb   :  { %v957_v21 = vmax.f32 %v955_v59, %v956_v12  ;;  %v742_v1 = vadd.f32 %v741_v33, %v2862_v38  ;;  %v1602_v38 = vsel %vm882_vm4, %v1476_v27, -inf }
 0x1ec   :  { %v1409_v36 = vadd.f32 %v1354_v20, %v1201_v56  ;;  %v1599_v43 = vmax.f32 %v1597_v46, %v1598_v62 }
 0x1ed   :  { %v958_v6 = vrot.slane %v957_v21, 4  ;;  %v798_v44 = vadd.f32 %v2921_v10, %v742_v1 }
 0x1ee   :  { %v1445_v47 = vadd.f32 %v2936_v54, %v1409_v36  ;;  %v1600_v11 = vrot.slane %v1599_v43, 1 }
 0x1ef   :  { %v959_v63 = vmax.f32 %v957_v21, %v958_v6  ;;  %v830_v51 = vmax.f32 %v798_v44, 0.0 }
 0x1f0   :  { %v1477_v4 = vmax.f32 %v1445_v47, 0.0  ;;  %v1104_v57 = vpop.f32.mrf.mxu2  ;;  %v1601_v42 = vmax.f32 %v1599_v43, %v1600_v11 }
 0x1f1   :  { %v1203_v40 = vpop.f32.mrf.mxu3  ;;  %v964_v45 = vsel %vm882_vm4, %v830_v51, -inf }
 0x1f2   :  { %v1515_v17 = vsel %vm1493_vm5, %v1477_v4, -1.0  ;;  %v1204_v25 = vadd.f32 %v1203_v40, %v1102_v14  ;;  %v743_v60 = vpop.f32.mrf.mxu1  ;;  %v1359_v35 = vpop.f32.mrf.mxu0  ;;  %v3148_v9 = vsel %vm1702_vm12, %v1601_v42, %v1734_v5  ;;  %v960_v5 = vrot.slane %v959_v63, 2 }
 0x1f3   :  { %v1603_v15 = vsel %vm882_vm4, %v1515_v17, -inf  ;;  %v744_v7 = vadd.f32 %v743_v60, %v2876_v16 }
 0x1f4   :  { %v1604_v41 = vmax.f32 %v1602_v38, %v1603_v15  ;;  %v1410_v20 = vadd.f32 %v1357_v58, %v1204_v25  ;;  %v961_v62 = vmax.f32 %v959_v63, %v960_v5 }
 0x1f5   :  { %v799_v8 = vadd.f32 %v2921_v10, %v744_v7 }
 0x1f6   :  { %v1446_v24 = vadd.f32 %v2936_v54, %v1410_v20  ;;  %v1605_v14 = vrot.slane %v1604_v41, 4  ;;  %v962_v47 = vrot.slane %v961_v62, 1 }
 0x1f7   :  { %v831_v52 = vmax.f32 %v799_v8, 0.0 }
 0x1f8   :  { %v1107_v34 = vpop.f32.mrf.mxu2  ;;  %v1478_v56 = vmax.f32 %v1446_v24, 0.0  ;;  %v1606_v58 = vmax.f32 %v1604_v41, %v1605_v14  ;;  %v963_v7 = vmax.f32 %v961_v62, %v962_v47 }
 0x1f9   :  { %v869_v19 = vsel %vm845_vm3, %v831_v52, -1.0  ;;  %v1205_v28 = vpop.f32.mrf.mxu3 }
 0x1fa   :  { %v965_v22 = vsel %vm882_vm4, %v869_v19, -inf  ;;  %v1206_v2 = vadd.f32 %v1205_v28, %v1104_v57  ;;  %v746_v50 = vpop.f32.mrf.mxu1  ;;  %v1362_v16 = vpop.f32.mrf.mxu0  ;;  %v1611_v42 = vsel %vm882_vm4, %v1478_v56, -inf  ;;  %v1607_v17 = vrot.slane %v1606_v58, 2 }
 0x1fb   :  { %v966_v46 = vmax.f32 %v964_v45, %v965_v22  ;;  %v747_v12 = vadd.f32 %v746_v50, %v2884_v18 }
 0x1fc   :  { %v1411_v37 = vadd.f32 %v1359_v35, %v1206_v2  ;;  %v1608_v8 = vmax.f32 %v1606_v58, %v1607_v17 }
 0x1fd   :  { %v967_v48 = vrot.slane %v966_v46, 4  ;;  %v800_v11 = vadd.f32 %v2921_v10, %v747_v12 }
 0x1fe   :  { %v1447_v59 = vadd.f32 %v2936_v54, %v1411_v37  ;;  %v1609_v24 = vrot.slane %v1608_v8, 1 }
 0x1ff   :  { %v968_v33 = vmax.f32 %v966_v46, %v967_v48  ;;  %v832_v15 = vmax.f32 %v800_v11, 0.0 }
 0x200   :  { %v1479_v30 = vmax.f32 %v1447_v59, 0.0  ;;  %v1109_v21 = vpop.f32.mrf.mxu2 }
 0x201   :  { %v969_v36 = vrot.slane %v968_v33, 2  ;;  %v1208_v43 = vpop.f32.mrf.mxu3  ;;  %v973_v28 = vsel %vm882_vm4, %v832_v15, -inf }
 0x202   :  { %v1517_v1 = vsel %vm1493_vm5, %v1479_v30, -1.0  ;;  %v1209_v27 = vadd.f32 %v1208_v43, %v1107_v34  ;;  %v748_v4 = vpop.f32.mrf.mxu1  ;;  %v1364_v57 = vpop.f32.mrf.mxu0 }
 0x203   :  { %v970_v6 = vmax.f32 %v968_v33, %v969_v36  ;;  %v1612_v18 = vsel %vm882_vm4, %v1517_v1, -inf  ;;  %v749_v40 = vadd.f32 %v748_v4, %v2900_v29  ;;  %v1610_v33 = vmax.f32 %v1608_v8, %v1609_v24 }
 0x204   :  { %v1613_v44 = vmax.f32 %v1611_v42, %v1612_v18  ;;  %v1412_v25 = vadd.f32 %v1362_v16, %v1209_v27 }
 0x205   :  { %v971_v60 = vrot.slane %v970_v6, 1  ;;  %v801_v35 = vadd.f32 %v2921_v10, %v749_v40 }
 0x206   :  { %v1614_v38 = vrot.slane %v1613_v44, 4  ;;  %v1448_v50 = vadd.f32 %v2936_v54, %v1412_v25 }
 0x207   :  { %v972_v41 = vmax.f32 %v970_v6, %v971_v60  ;;  %v833_v20 = vmax.f32 %v801_v35, 0.0 }
 0x208   :  { %v1615_v63 = vmax.f32 %v1613_v44, %v1614_v38  ;;  %v1112_v51 = vpop.f32.mrf.mxu2  ;;  %v1480_v12 = vmax.f32 %v1448_v50, 0.0  ;;  %v3186_v44 = vld [vmem:[%s3302_s4] ss:$0 sm:$0xff] }
 0x209   :  { %v1704_v52 = vsel %vm1690_vm6, %v972_v41, %v963_v7  ;;  %v871_v34 = vsel %vm845_vm3, %v833_v20, -1.0  ;;  %v1210_v29 = vpop.f32.mrf.mxu3 }
 0x20a   :  { %v1616_v19 = vrot.slane %v1615_v63, 2  ;;  %v974_v5 = vsel %vm882_vm4, %v871_v34, -inf  ;;  %v1211_v45 = vadd.f32 %v1210_v29, %v1109_v21  ;;  %v751_v22 = vpop.f32.mrf.mxu1  ;;  %v1367_v2 = vpop.f32.mrf.mxu0 }
 0x20b   :  { %v975_v16 = vmax.f32 %v973_v28, %v974_v5  ;;  %v752_v59 = vadd.f32 %v751_v22, %v2820_v53  ;;  %v1620_v53 = vsel %vm882_vm4, %v1480_v12, -inf  ;;  %v3201_v28 = vld [vmem:[%s3303_s5] ss:$0 sm:$0xff] }
 0x20c   :  { %v1617_v46 = vmax.f32 %v1615_v63, %v1616_v19  ;;  %v1413_v14 = vadd.f32 %v1364_v57, %v1211_v45 }
 0x20d   :  { %v976_v37 = vrot.slane %v975_v16, 4  ;;  %v802_v1 = vadd.f32 %v2921_v10, %v752_v59 }
 0x20e   :  { %v1618_v48 = vrot.slane %v1617_v46, 1  ;;  %v1449_v62 = vadd.f32 %v2936_v54, %v1413_v14 }
 0x20f   :  { %v977_v56 = vmax.f32 %v975_v16, %v976_v37  ;;  %v834_v60 = vmax.f32 %v802_v1, 0.0 }
 0x210   :  { %v1619_v58 = vmax.f32 %v1617_v46, %v1618_v48  ;;  %v1481_v30 = vmax.f32 %v1449_v62, 0.0  ;;  %v1114_v21 = vpop.f32.mrf.mxu2 }
 0x211   :  { %v978_v36 = vrot.slane %v977_v56, 2  ;;  %v1213_v43 = vpop.f32.mrf.mxu3  ;;  %v982_v63 = vsel %vm882_vm4, %v834_v60, -inf }
 0x212   :  { %v1519_v47 = vsel %vm1493_vm5, %v1481_v30, -1.0  ;;  %v1214_v11 = vadd.f32 %v1213_v43, %v1112_v51  ;;  %v753_v27 = vpop.f32.mrf.mxu1  ;;  %v1369_v4 = vpop.f32.mrf.mxu0  ;;  %v1736_v54 = vsel %vm1690_vm6, %v1619_v58, %v1610_v33 }
 0x213   :  { %v979_v57 = vmax.f32 %v977_v56, %v978_v36  ;;  %v1621_v42 = vsel %vm882_vm4, %v1519_v47, -inf  ;;  %v754_v6 = vadd.f32 %v753_v27, %v2827_v23 }
 0x214   :  { %v1622_v18 = vmax.f32 %v1620_v53, %v1621_v42  ;;  %v1414_v40 = vadd.f32 %v1367_v2, %v1214_v11 }
 0x215   :  { %v980_v17 = vrot.slane %v979_v57, 1  ;;  %v803_v10 = vadd.f32 %v3186_v44, %v754_v6 }
 0x216   :  { %v1623_v25 = vrot.slane %v1622_v18, 4 }
 0x217   :  { %v981_v35 = vmax.f32 %v979_v57, %v980_v17  ;;  %v835_v38 = vmax.f32 %v803_v10, 0.0 }
 0x218   :  { %v1624_v15 = vmax.f32 %v1622_v18, %v1623_v25  ;;  %v3189_v7 = vpop.f32.mrf.mxu2 }
 0x219   :  { %v1705_v41 = vsel %vm1692_vm7, %v981_v35, %v1704_v52  ;;  %v873_v23 = vsel %vm845_vm3, %v835_v38, -1.0  ;;  %v1215_v20 = vpop.f32.mrf.mxu3  ;;  %v1450_v52 = vadd.f32 %v3201_v28, %v1414_v40 }
 0x21a   :  { %v1625_v8 = vrot.slane %v1624_v15, 2  ;;  %v983_v51 = vsel %vm882_vm4, %v873_v23, -inf  ;;  %v1216_v34 = vadd.f32 %v1215_v20, %v1114_v21  ;;  %v756_v29 = vpop.f32.mrf.mxu1  ;;  %v3196_v19 = vpop.f32.mrf.mxu0 }
 0x21b   :  { %v984_v5 = vmax.f32 %v982_v63, %v983_v51  ;;  %v757_v24 = vadd.f32 %v756_v29, %v2840_v0  ;;  %v1482_v46 = vmax.f32 %v1450_v52, 0.0 }
 0x21c   :  { %v1626_v45 = vmax.f32 %v1624_v15, %v1625_v8  ;;  %v1415_v22 = vadd.f32 %v1369_v4, %v1216_v34 }
 0x21d   :  { %v985_v2 = vrot.slane %v984_v5, 4  ;;  %v804_v33 = vadd.f32 %v3186_v44, %v757_v24  ;;  %v1629_v36 = vsel %vm882_vm4, %v1482_v46, -inf }
 0x21e   :  { %v1627_v50 = vrot.slane %v1626_v45, 1  ;;  %v1451_v16 = vadd.f32 %v3201_v28, %v1415_v22 }
 0x21f   :  { %v986_v14 = vmax.f32 %v984_v5, %v985_v2  ;;  %v836_v53 = vmax.f32 %v804_v33, 0.0 }
 0x220   :  { %v1628_v37 = vmax.f32 %v1626_v45, %v1627_v50  ;;  %v1483_v48 = vmax.f32 %v1451_v16, 0.0  ;;  %v1119_v62 = vpop.f32.mrf.mxu2 }
 0x221   :  { %v987_v59 = vrot.slane %v986_v14, 2  ;;  %v3206_v12 = vpop.f32.mrf.mxu3  ;;  %v991_v25 = vsel %vm882_vm4, %v836_v53, -inf }
 0x222   :  { %v1521_v56 = vsel %vm1493_vm5, %v1483_v48, -1.0  ;;  %v758_v58 = vpop.f32.mrf.mxu1  ;;  %v1374_v30 = vpop.f32.mrf.mxu0  ;;  %v1737_v21 = vsel %vm1692_vm7, %v1628_v37, %v1736_v54 }
 0x223   :  { %v988_v0 = vmax.f32 %v986_v14, %v987_v59  ;;  %v1630_v43 = vsel %vm882_vm4, %v1521_v56, -inf  ;;  %v759_v47 = vadd.f32 %v758_v58, %v2847_v3 }
 0x224   :  { %v1631_v1 = vmax.f32 %v1629_v36, %v1630_v43 }
 0x225   :  { %v989_v11 = vrot.slane %v988_v0, 1  ;;  %v805_v27 = vadd.f32 %v3186_v44, %v759_v47 }
 0x226   :  { %v1632_v4 = vrot.slane %v1631_v1, 4 }
 0x227   :  { %v990_v57 = vmax.f32 %v988_v0, %v989_v11  ;;  %v837_v42 = vmax.f32 %v805_v27, 0.0 }
 0x228   :  { %v1633_v6 = vmax.f32 %v1631_v1, %v1632_v4  ;;  %v1122_v18 = vpop.f32.mrf.mxu2  ;;  %v1219_v4 = vadd.f32 %v3206_v12, %v3189_v7  ;;  %v1962_v12 = vld [vmem:[%s3304_s6] sm:$0xff]  ;;  %s2015_s6 = smov 16  }
 0x229   :  { %v875_v54 = vsel %vm845_vm3, %v837_v42, -1.0  ;;  %v1220_v40 = vpop.f32.mrf.mxu3  ;;  %v1706_v17 = vsel %vm1694_vm8, %v990_v57, %v1705_v41  ;;  %1782 = vmatpush.bf16.msra.mxu1 %v1962_v12 }
 0x22a   :  { %v1634_v10 = vrot.slane %v1633_v6, 2  ;;  %v992_v3 = vsel %vm882_vm4, %v875_v54, -inf  ;;  %v761_v60 = vpop.f32.mrf.mxu1  ;;  %v1377_v35 = vpop.f32.mrf.mxu0  ;;  %v1221_v36 = vadd.f32 %v1220_v40, %v1119_v62 }
 0x22b   :  { %v993_v38 = vmax.f32 %v991_v25, %v992_v3  ;;  %v762_v8 = vadd.f32 %v761_v60, %v2856_v61 }
 0x22c   :  { %v1635_v15 = vmax.f32 %v1633_v6, %v1634_v10  ;;  %v1417_v27 = vadd.f32 %v1374_v30, %v1221_v36 }
 0x22d   :  { %v994_v23 = vrot.slane %v993_v38, 4  ;;  %v806_v41 = vadd.f32 %v3186_v44, %v762_v8 }
 0x22e   :  { %v1636_v20 = vrot.slane %v1635_v15, 1  ;;  %v1453_v40 = vadd.f32 %v3201_v28, %v1417_v27 }
 0x22f   :  { %v995_v63 = vmax.f32 %v993_v38, %v994_v23  ;;  %v838_v46 = vmax.f32 %v806_v41, 0.0 }
 0x230   :  { %v1637_v51 = vmax.f32 %v1635_v15, %v1636_v20  ;;  %v1124_v29 = vpop.f32.mrf.mxu2  ;;  %v1485_v20 = vmax.f32 %v1453_v40, 0.0 }
 0x231   :  { %v996_v34 = vrot.slane %v995_v63, 2  ;;  %v1223_v52 = vpop.f32.mrf.mxu3  ;;  %v1000_v56 = vsel %vm882_vm4, %v838_v46, -inf }
 0x232   :  { %v763_v5 = vpop.f32.mrf.mxu1  ;;  %v3224_v45 = vsel %vm1694_vm8, %v1637_v51, %v1737_v21  ;;  %v1379_v50 = vpop.f32.mrf.mxu0  ;;  %v1224_v53 = vadd.f32 %v1223_v52, %v1122_v18 }
 0x233   :  { %v997_v22 = vmax.f32 %v995_v63, %v996_v34  ;;  %v764_v2 = vadd.f32 %v763_v5, %v2864_v55 }
 0x234   :  { %v1418_v3 = vadd.f32 %v1377_v35, %v1224_v53 }
 0x235   :  { %v998_v16 = vrot.slane %v997_v22, 1  ;;  %v807_v24 = vadd.f32 %v3186_v44, %v764_v2 }
 0x236   :  { %v1454_v35 = vadd.f32 %v3201_v28, %v1418_v3 }
 0x237   :  { %v999_v61 = vmax.f32 %v997_v22, %v998_v16  ;;  %v839_v14 = vmax.f32 %v807_v24, 0.0 }
 0x238   :  { %v1127_v55 = vpop.f32.mrf.mxu2 }
 0x239   :  { %v877_v37 = vsel %vm845_vm3, %v839_v14, -1.0  ;;  %v1225_v48 = vpop.f32.mrf.mxu3  ;;  %v1707_v59 = vsel %vm1696_vm9, %v999_v61, %v1706_v17  ;;  %v1486_v14 = vmax.f32 %v1454_v35, 0.0 }
 0x23a   :  { %v1001_v33 = vsel %vm882_vm4, %v877_v37, -inf  ;;  %v766_v58 = vpop.f32.mrf.mxu1  ;;  %v1382_v43 = vpop.f32.mrf.mxu0  ;;  %v1226_v47 = vadd.f32 %v1225_v48, %v1124_v29 }
 0x23b   :  { %v1002_v21 = vmax.f32 %v1000_v56, %v1001_v33  ;;  %v767_v1 = vadd.f32 %v766_v58, %v2878_v26  ;;  %v1416_v26 = vadd.f32 %v3196_v19, %v1219_v4  ;;  %v1647_v27 = vsel %vm882_vm4, %v1486_v14, -inf }
 0x23c   :  { %v1419_v6 = vadd.f32 %v1379_v50, %v1226_v47  ;;  %v1523_v50 = vsel %vm1493_vm5, %v1485_v20, -1.0 }
 0x23d   :  { %v1003_v0 = vrot.slane %v1002_v21, 4  ;;  %v808_v54 = vadd.f32 %v3186_v44, %v767_v1  ;;  %v1452_v19 = vadd.f32 %v3201_v28, %v1416_v26  ;;  %v1639_v56 = vsel %vm882_vm4, %v1523_v50, -inf }
 0x23e   :  { %v1455_v18 = vadd.f32 %v3201_v28, %v1419_v6 }
 0x23f   :  { %v1004_v11 = vmax.f32 %v1002_v21, %v1003_v0  ;;  %v840_v38 = vmax.f32 %v808_v54, 0.0  ;;  %v1484_v46 = vmax.f32 %v1452_v19, 0.0 }
 0x240   :  { %v1129_v60 = vpop.f32.mrf.mxu2  ;;  %v1487_v29 = vmax.f32 %v1455_v18, 0.0 }
 0x241   :  { %v1005_v57 = vrot.slane %v1004_v11, 2  ;;  %v1228_v42 = vpop.f32.mrf.mxu3  ;;  %v1009_v52 = vsel %vm882_vm4, %v840_v38, -inf  ;;  %v1638_v36 = vsel %vm882_vm4, %v1484_v46, -inf }
 0x242   :  { %v768_v17 = vpop.f32.mrf.mxu1  ;;  %v1229_v25 = vadd.f32 %v1228_v42, %v1127_v55  ;;  %v1525_v37 = vsel %vm1493_vm5, %v1487_v29, -1.0 }
 0x243   :  { %v1006_v10 = vmax.f32 %v1004_v11, %v1005_v57  ;;  %v769_v62 = vadd.f32 %v768_v17, %v2886_v13  ;;  %v1384_v13 = vpop.f32.mrf.mxu0  ;;  %v1648_v0 = vsel %vm882_vm4, %v1525_v37, -inf  ;;  %v1640_v11 = vmax.f32 %v1638_v36, %v1639_v56 }
 0x244   :  { %v1420_v8 = vadd.f32 %v1382_v43, %v1229_v25  ;;  %v1649_v17 = vmax.f32 %v1647_v27, %v1648_v0 }
 0x245   :  { %v1007_v30 = vrot.slane %v1006_v10, 1  ;;  %v809_v7 = vadd.f32 %v3186_v44, %v769_v62  ;;  %v1641_v3 = vrot.slane %v1640_v11, 4 }
 0x246   :  { %v1456_v16 = vadd.f32 %v3201_v28, %v1420_v8  ;;  %v1650_v12 = vrot.slane %v1649_v17, 4 }
 0x247   :  { %v1008_v15 = vmax.f32 %v1006_v10, %v1007_v30  ;;  %v841_v23 = vmax.f32 %v809_v7, 0.0 }
 0x248   :  { %v1132_v58 = vpop.f32.mrf.mxu2  ;;  %v1488_v21 = vmax.f32 %v1456_v16, 0.0 }
 0x249   :  { %v879_v63 = vsel %vm845_vm3, %v841_v23, -1.0  ;;  %v1230_v51 = vpop.f32.mrf.mxu3  ;;  %v1708_v34 = vsel %vm1698_vm10, %v1008_v15, %v1707_v59 }
 0x24a   :  { %v1010_v41 = vsel %vm882_vm4, %v879_v63, -inf  ;;  %v1231_v5 = vadd.f32 %v1230_v51, %v1129_v60  ;;  %v771_v22 = vpop.f32.mrf.mxu1  ;;  %v1656_v10 = vsel %vm882_vm4, %v1488_v21, -inf  ;;  %v1651_v51 = vmax.f32 %v1649_v17, %v1650_v12 }
 0x24b   :  { %v1011_v2 = vmax.f32 %v1009_v52, %v1010_v41  ;;  %v772_v59 = vadd.f32 %v771_v22, %v2902_v39  ;;  %v1387_v47 = vpop.f32.mrf.mxu0 }
 0x24c   :  { %v1421_v24 = vadd.f32 %v1384_v13, %v1231_v5 }
 0x24d   :  { %v1012_v61 = vrot.slane %v1011_v2, 4  ;;  %v810_v39 = vadd.f32 %v3186_v44, %v772_v59 }
 0x24e   :  { %v1457_v48 = vadd.f32 %v3201_v28, %v1421_v24 }
 0x24f   :  { %v1013_v33 = vmax.f32 %v1011_v2, %v1012_v61  ;;  %v842_v26 = vmax.f32 %v810_v39, 0.0 }
 0x250   :  { %v1489_v55 = vmax.f32 %v1457_v48, 0.0  ;;  %v1134_v38 = vpop.f32.mrf.mxu2 }
 0x251   :  { %v1014_v43 = vrot.slane %v1013_v33, 2  ;;  %v1233_v1 = vpop.f32.mrf.mxu3  ;;  %v1018_v13 = vsel %vm882_vm4, %v842_v26, -inf }
 0x252   :  { %v1527_v4 = vsel %vm1493_vm5, %v1489_v55, -1.0  ;;  %v773_v53 = vpop.f32.mrf.mxu1  ;;  %v1234_v6 = vadd.f32 %v1233_v1, %v1132_v58 }
 0x253   :  { %v1015_v57 = vmax.f32 %v1013_v33, %v1014_v43  ;;  %v1657_v42 = vsel %vm882_vm4, %v1527_v4, -inf  ;;  %v774_v54 = vadd.f32 %v773_v53, %v2910_v32  ;;  %v1389_v63 = vpop.f32.mrf.mxu0 }
 0x254   :  { %v1658_v40 = vmax.f32 %v1656_v10, %v1657_v42  ;;  %v1422_v60 = vadd.f32 %v1387_v47, %v1234_v6 }
 0x255   :  { %v1016_v62 = vrot.slane %v1015_v57, 1  ;;  %v811_v25 = vadd.f32 %v3186_v44, %v774_v54  ;;  %v1642_v44 = vmax.f32 %v1640_v11, %v1641_v3 }
 0x256   :  { %v1659_v18 = vrot.slane %v1658_v40, 4  ;;  %v1458_v19 = vadd.f32 %v3201_v28, %v1422_v60 }
 0x257   :  { %v1017_v30 = vmax.f32 %v1015_v57, %v1016_v62  ;;  %v843_v7 = vmax.f32 %v811_v25, 0.0  ;;  %v1643_v22 = vrot.slane %v1642_v44, 2 }
 0x258   :  { %v1660_v52 = vmax.f32 %v1658_v40, %v1659_v18  ;;  %v1490_v2 = vmax.f32 %v1458_v19, 0.0 }
 0x259   :  { %v881_v15 = vsel %vm845_vm3, %v843_v7, -1.0  ;;  %v1235_v23 = vpop.f32.mrf.mxu3  ;;  %v1709_v32 = vsel %vm1700_vm11, %v1017_v30, %v1708_v34  ;;  %v1652_v34 = vrot.slane %v1651_v51, 2  ;;  %v1644_v14 = vmax.f32 %v1642_v44, %v1643_v22  ;;  %v1985_v30 = vld [vmem:[%s3305_s7] ss:$0 sm:$0xff] }
 0x25a   :  { %v1019_v20 = vsel %vm882_vm4, %v881_v15, -inf  ;;  %v1236_v8 = vadd.f32 %v1235_v23, %v1134_v38  ;;  %v1661_v24 = vrot.slane %v1660_v52, 2  ;;  %v1665_v37 = vsel %vm882_vm4, %v1490_v2, -inf }
 0x25b   :  { %v1020_v35 = vmax.f32 %v1018_v13, %v1019_v20  ;;  %v1653_v56 = vmax.f32 %v1651_v51, %v1652_v34  ;;  %v1645_v55 = vrot.slane %v1644_v14, 1 }
 0x25c   :  { %v1423_v29 = vadd.f32 %v1389_v63, %v1236_v8  ;;  %v1662_v58 = vmax.f32 %v1660_v52, %v1661_v24 }
 0x25d   :  { %v1021_v41 = vrot.slane %v1020_v35, 4  ;;  %v1654_v0 = vrot.slane %v1653_v56, 1  ;;  %v1646_v11 = vmax.f32 %v1644_v14, %v1645_v55 }
 0x25e   :  { %v1459_v5 = vadd.f32 %v3201_v28, %v1423_v29  ;;  %v1663_v47 = vrot.slane %v1662_v58, 1 }
 0x25f   :  { %v1022_v50 = vmax.f32 %v1020_v35, %v1021_v41  ;;  %v1655_v27 = vmax.f32 %v1653_v56, %v1654_v0  ;;  %v1739_v57 = vsel %vm1696_vm9, %v1646_v11, %v3224_v45 }
 0x260   :  { %v1491_v16 = vmax.f32 %v1459_v5, 0.0  ;;  %v1664_v39 = vmax.f32 %v1662_v58, %v1663_v47 }
 0x261   :  { %v1023_v46 = vrot.slane %v1022_v50, 2  ;;  %v1740_v6 = vsel %vm1698_vm10, %v1655_v27, %v1739_v57 }
 0x262   :  { %v1529_v61 = vsel %vm1493_vm5, %v1491_v16, -1.0  ;;  %v1741_v54 = vsel %vm1700_vm11, %v1664_v39, %v1740_v6 }
 0x263   :  { %v1024_v48 = vmax.f32 %v1022_v50, %v1023_v46  ;;  %v1666_v59 = vsel %vm882_vm4, %v1529_v61, -inf }
 0x264   :  { %v1667_v33 = vmax.f32 %v1665_v37, %v1666_v59 }
 0x265   :  { %v1025_v28 = vrot.slane %v1024_v48, 1 }
 0x266   :  { %v1668_v21 = vrot.slane %v1667_v33, 4 }
 0x267   :  { %v1026_v36 = vmax.f32 %v1024_v48, %v1025_v28 }
 0x268   :  { %v1669_v43 = vmax.f32 %v1667_v33, %v1668_v21 }
 0x269   :  { %v1710_v1 = vsel %vm1702_vm12, %v1026_v36, %v1709_v32 }
 0x26a   :  { %v1670_v31 = vrot.slane %v1669_v43, 2 }
 0x26c   :  { %v1671_v4 = vmax.f32 %v1669_v43, %v1670_v31 }
 0x26e   :  { %v1672_v53 = vrot.slane %v1671_v4, 1 }
 0x270   :  { %v1673_v42 = vmax.f32 %v1671_v4, %v1672_v53 }
 0x272   :  { %v1742_v17 = vsel %vm1702_vm12, %v1673_v42, %v1741_v54 }
 0x273   :  { %v1978_v10 = vpack.i.bf16 %v1742_v17, %v3148_v9 }
 0x275   :  { %1979 = vrot.lane.b32.xlu2 %v1978_v10, %s2015_s6 }
 0x2cf   :  { %v1980_v62 = vpop.permute.xlu2 %1979 }
 0x2d0   :  { %v1982_v40 = vunpack.i.h.bf16 %v1980_v62  ;;  %v1981_v25 = vunpack.i.l.bf16 %v1980_v62 }
 0x2d2   :  { %v1749_v26 = vsel %vm882_vm4, %v3137_v49, %v1981_v25  ;;  %v1750_v3 = vsel %vm882_vm4, %v1710_v1, %v1982_v40 }
 0x2d3   :  { %v1751_v45 = vpack.c.bf16 %v1750_v3, %v1749_v26 }
 0x2d5   :  { %1951 = vmatmul.msk.bf16.vlgmr.msra.gmra.mxu1 %vm489_vm2, %v1751_v45 }
 0x352   :  { %v1784_v60 = vpop.f32.mrf.mxu1 }
 0x353   :  { %v1785_v7 = vadd.f32 %v1985_v30, %v1784_v60 }
 0x355   :  { %v1789_v9 = vmax.f32 %v1785_v7, 0.0 }
 0x357   :  { %1791 = vst [vmem:[#allocation2] sm:$0xff] %v1789_v9 }
 0x35a   :  { %v1786_v49 = vpop.f32.mrf.mxu1 }
 0x35b   :  { %v1787_v12 = vadd.f32 %v1985_v30, %v1786_v49 }
 0x35d   :  { %v1790_v18 = vmax.f32 %v1787_v12, 0.0 }
 0x35f   :  { %1792 = vst [vmem:[#allocation2 + $0x8] sm:$0xff] %v1790_v18 }
 0x360   :  { %1805 = dma.vmem_to_hbm [thread:$0]  %s1798_s26, 256, %s1800_s28, [#allocation3], %s2017_s29, %s2017_s29, %s2018_s2  }
 0x361   :  { %2012 = dma.done.wait [#allocation3], 256  }
 0x362   :  { %2013 = vsyncadd [#allocation3], 4294967040 }
 0x363   :  { %1810 = vsyncpa [#allocation3], 1 }

</bundles_post_ra>
